<compile_context>
chip_gen: v7x
topology: tpu7x:2x2x1
jax: 0.10.0
libtpu: 0.0.40
codegen_flags: <defaults>
</compile_context>

<pallas_src>
import functools

import jax
import jax.numpy as jnp
from jax import lax
from jax.experimental import pallas as pl
from jax.experimental.pallas import tpu as pltpu


# ----------------------------------------------------------------------------
# Fused forward kernel (wavefront-skewed two-layer GRU + Linear + log_softmax)
# ----------------------------------------------------------------------------
def _gru_forward_kernel(x_ref, hh0_ref, wih1p_ref, biasp_ref, wblk_ref,
                        bhn12_ref, wlinp_ref, blin_ref,
                        out_ref, h1T_ref, h2T_ref,
                        a_scr, y_scr):
    T = x_ref.shape[0]
    H2 = hh0_ref.shape[-1]          # 2H
    H = H2 // 2
    f32 = jnp.float32

    w_blk = wblk_ref[...].astype(f32)        # (2H, 8H) packed recurrent weight
    b_hn12 = bhn12_ref[...].astype(f32)      # (1, 2H)  [b_hn1 | b_hn2]
    bias_p = biasp_ref[...].astype(f32)      # (1, 6H)  packed per-step bias

    # Hoisted layer-1 input projection + all pre-foldable biases, one matmul,
    # already in the per-step lane layout [r1 | r2 | z1 | z2 | n1 | n2].
    a_scr[...] = (jnp.dot(x_ref[...].astype(f32), wih1p_ref[...].astype(f32),
                          preferred_element_type=f32) + bias_p)

    # Lane mask selecting the layer-1 half of the fused state [h1 | h2].
    lane = lax.broadcasted_iota(jnp.int32, (1, H2), 1)
    l1_mask = lane < H

    def fused_math(a, hh):
        # One MXU push: all hidden/input projections for both layers.
        g = jnp.dot(hh, w_blk, preferred_element_type=f32)          # (1, 8H)
        # r/z of both layers in one sigmoid (tanh form, single EUP push).
        rz = 0.5 * jnp.tanh(0.5 * (g[:, :4 * H] + a[:, :4 * H])) + 0.5
        r12 = rz[:, :H2]
        z12 = rz[:, H2:]
        # n of both layers in one tanh (g[:, 6H:8H] == [0 | gi2_n]).
        n12 = jnp.tanh(a[:, 4 * H:] + g[:, 6 * H:]
                       + r12 * (g[:, 4 * H:6 * H] + b_hn12))
        return n12 + z12 * (hh - n12)                                # (1, 2H)

    hh = hh0_ref[...].astype(f32)                                    # [h1 | h2]

    # Wavefront prologue (s = 0): only layer-1 fires; keep h2 half unchanged.
    hh = jnp.where(l1_mask, fused_math(a_scr[pl.ds(0, 1), :], hh), hh)

    # Fused wavefront steps s = 1..T-1: layer-1 timestep s and layer-2
    # timestep s-1 share a single block-diagonal matmul.
    def body(s, hh):
        hh_new = fused_math(a_scr[pl.ds(s, 1), :], hh)
        y_scr[pl.ds(s - 1, 1), :] = hh_new        # layer-2 half is y2_{s-1}
        return hh_new

    hh = lax.fori_loop(1, T, body, hh, unroll=True)

    # Wavefront epilogue (s = T): only layer-2 fires; its per-step additive
    # term is just the constant bias row.  Layer-1 half is discarded.
    hh_last = fused_math(bias_p, hh)
    y_scr[pl.ds(T - 1, 1), :] = hh_last
    hh = jnp.where(l1_mask, hh, hh_last)

    # Linear over the whole (T, 2H) slab (layer-1 half zeroed via padded
    # weight) + log_softmax.
    logits = (jnp.dot(y_scr[...], wlinp_ref[...].astype(f32),
                      preferred_element_type=f32)
              + blin_ref[...].astype(f32))                           # (T, O)
    m = jnp.max(logits, axis=-1, keepdims=True)
    s = logits - m
    lse = jnp.log(jnp.sum(jnp.exp(s), axis=-1, keepdims=True))
    out_ref[...] = (s - lse).astype(out_ref.dtype)
    h1T_ref[...] = hh[:, :H].astype(h1T_ref.dtype)
    h2T_ref[...] = hh[:, H:].astype(h2T_ref.dtype)


def gru_forward(packed, x):
    """x: (T, 1, input_size) -> ((T, output_size) log-probs, h1_T, h2_T)."""
    T = x.shape[0]
    H = packed["hh0"].shape[-1] // 2
    O = packed["w_lin_pad"].shape[-1]
    x2 = x[:, 0, :]                                   # (T, I), lane-dense

    out, h1T, h2T = pl.pallas_call(
        _gru_forward_kernel,
        out_shape=(
            jax.ShapeDtypeStruct((T, O), x.dtype),    # log-probs
            jax.ShapeDtypeStruct((1, H), x.dtype),    # final hidden, layer 1
            jax.ShapeDtypeStruct((1, H), x.dtype),    # final hidden, layer 2
        ),
        scratch_shapes=[
            pltpu.VMEM((T, 6 * H), jnp.float32),      # hoisted per-step adds
            pltpu.VMEM((T, 2 * H), jnp.float32),      # fused output slab
        ],
    )(x2, packed["hh0"], packed["w_ih1p"], packed["bias_p"], packed["w_blk"],
      packed["b_hn12"], packed["w_lin_pad"], packed["b_lin"])
    return out, h1T, h2T


# ----------------------------------------------------------------------------
# Parameter packing (done ONCE, outside the per-call forward)
# ----------------------------------------------------------------------------
def prepare_params(params):
    H = params["h1"].shape[-1]
    I = params["w_ih1"].shape[0]
    O = params["w_lin"].shape[-1]
    f32 = jnp.float32

    w_ih1, w_hh1 = params["w_ih1"], params["w_hh1"]
    w_ih2, w_hh2 = params["w_ih2"], params["w_hh2"]
    b_ih1, b_hh1 = params["b_ih1"], params["b_hh1"]
    b_ih2, b_hh2 = params["b_ih2"], params["b_hh2"]

    # Layer-1 input weight packed into the interleaved per-step lane layout:
    # columns [r1 | r2(zero) | z1 | z2(zero) | n1 | n2(zero)].
    w_ih1p = jnp.zeros((I, 6 * H), f32)
    w_ih1p = w_ih1p.at[:, 0:H].set(w_ih1[:, 0:H])
    w_ih1p = w_ih1p.at[:, 2 * H:3 * H].set(w_ih1[:, H:2 * H])
    w_ih1p = w_ih1p.at[:, 4 * H:5 * H].set(w_ih1[:, 2 * H:3 * H])

    # Packed per-step bias row (same lane layout).  r/z hidden biases fold in;
    # b_hn stays separate because it is multiplied by r.
    bias_p = jnp.concatenate([
        b_ih1[:, 0:H] + b_hh1[:, 0:H],            # r1
        b_ih2[:, 0:H] + b_hh2[:, 0:H],            # r2
        b_ih1[:, H:2 * H] + b_hh1[:, H:2 * H],    # z1
        b_ih2[:, H:2 * H] + b_hh2[:, H:2 * H],    # z2
        b_ih1[:, 2 * H:3 * H],                    # n1 (input part)
        b_ih2[:, 2 * H:3 * H],                    # n2 (input part)
    ], axis=-1)

    b_hn12 = jnp.concatenate([b_hh1[:, 2 * H:], b_hh2[:, 2 * H:]], axis=-1)

    # Skewed block-diagonal recurrent weight (2H, 8H); LHS is [h1 | h2].
    # Output columns:
    # [gh1_r | gi2_r+gh2_r | gh1_z | gi2_z+gh2_z | gh1_n | gh2_n | 0 | gi2_n]
    w_blk = jnp.zeros((2 * H, 8 * H), f32)
    w_blk = w_blk.at[0:H, 0:H].set(w_hh1[:, 0:H])
    w_blk = w_blk.at[0:H, H:2 * H].set(w_ih2[:, 0:H])
    w_blk = w_blk.at[H:2 * H, H:2 * H].set(w_hh2[:, 0:H])
    w_blk = w_blk.at[0:H, 2 * H:3 * H].set(w_hh1[:, H:2 * H])
    w_blk = w_blk.at[0:H, 3 * H:4 * H].set(w_ih2[:, H:2 * H])
    w_blk = w_blk.at[H:2 * H, 3 * H:4 * H].set(w_hh2[:, H:2 * H])
    w_blk = w_blk.at[0:H, 4 * H:5 * H].set(w_hh1[:, 2 * H:3 * H])
    w_blk = w_blk.at[H:2 * H, 5 * H:6 * H].set(w_hh2[:, 2 * H:3 * H])
    # columns 6H:7H stay zero so g[:, 6H:8H] == [0 | gi2_n] is one flat slice
    w_blk = w_blk.at[0:H, 7 * H:8 * H].set(w_ih2[:, 2 * H:3 * H])

    # Linear weight zero-padded to (2H, O): only the layer-2 half contributes.
    w_lin_pad = jnp.zeros((2 * H, O), f32).at[H:, :].set(params["w_lin"])

    hh0 = jnp.concatenate([params["h1"], params["h2"]], axis=-1)

    return {"hh0": hh0, "w_ih1p": w_ih1p, "bias_p": bias_p, "w_blk": w_blk,
            "b_hn12": b_hn12, "w_lin_pad": w_lin_pad, "b_lin": params["b_lin"]}


# ----------------------------------------------------------------------------
# Raw parameters (fused gate layout: [r | z | n] along the 3H axis)
# ----------------------------------------------------------------------------
def init_params(key, input_size, hidden_size, output_size):
    ks = jax.random.split(key, 12)
    bound = 1.0 / jnp.sqrt(hidden_size)

    def u(k, shape):
        return jax.random.uniform(k, shape, jnp.float32, -bound, bound)

    return {
        # GRU layer 1
        "w_ih1": u(ks[0], (input_size, 3 * hidden_size)),
        "w_hh1": u(ks[1], (hidden_size, 3 * hidden_size)),
        "b_ih1": u(ks[2], (1, 3 * hidden_size)),
        "b_hh1": u(ks[3], (1, 3 * hidden_size)),
        # GRU layer 2
        "w_ih2": u(ks[4], (hidden_size, 3 * hidden_size)),
        "w_hh2": u(ks[5], (hidden_size, 3 * hidden_size)),
        "b_ih2": u(ks[6], (1, 3 * hidden_size)),
        "b_hh2": u(ks[7], (1, 3 * hidden_size)),
        # Linear (stored pre-transposed: (H, O))
        "w_lin": u(ks[8], (hidden_size, output_size)),
        "b_lin": u(ks[9], (1, output_size)),
        # init_hidden(): randn(1, 1, hidden) -> stored as (1, H)
        "h1": jax.random.normal(ks[10], (1, hidden_size), jnp.float32),
        "h2": jax.random.normal(ks[11], (1, hidden_size), jnp.float32),
    }


# ----------------------------------------------------------------------------
# Pure-JAX reference (lax.scan) used to sanity-check the Pallas kernel.
# ----------------------------------------------------------------------------
def _gru_layer_ref(x, h0, w_ih, w_hh, b_ih, b_hh):
    H = h0.shape[-1]

    def step(h, xt):
        gi = xt[None, :] @ w_ih + b_ih
        gh = h @ w_hh + b_hh
        r = jax.nn.sigmoid(gi[:, :H] + gh[:, :H])
        z = jax.nn.sigmoid(gi[:, H:2 * H] + gh[:, H:2 * H])
        n = jnp.tanh(gi[:, 2 * H:] + r * gh[:, 2 * H:])
        h_new = (1.0 - z) * n + z * h
        return h_new, h_new[0]

    hT, ys = lax.scan(step, h0, x)
    return ys, hT


def _forward_ref(params, x):
    x2 = x[:, 0, :]
    y1, h1T = _gru_layer_ref(x2, params["h1"], params["w_ih1"], params["w_hh1"],
                             params["b_ih1"], params["b_hh1"])
    y2, h2T = _gru_layer_ref(y1, params["h2"], params["w_ih2"], params["w_hh2"],
                             params["b_ih2"], params["b_hh2"])
    logits = y2 @ params["w_lin"] + params["b_lin"]
    return jax.nn.log_softmax(logits, axis=-1), h1T, h2T


if __name__ == "__main__":
    input_size, hidden_size, output_size = 16, 32, 16
    seq_len = 8

    key = jax.random.PRNGKey(0)
    k_param, k_x = jax.random.split(key)
    params = init_params(k_param, input_size, hidden_size, output_size)
    packed = prepare_params(params)          # one-time weight packing (no jit)

    # Input sequence, shape (T, 1, input_size) like the PyTorch call.
    x = jax.random.normal(k_x, (seq_len, 1, input_size), jnp.float32)

    fwd = jax.jit(gru_forward)
    out, h1T, h2T = fwd(packed, x)
    out = jax.block_until_ready(out)

    ref_out, ref_h1, ref_h2 = _forward_ref(params, x)
    assert out.shape == (seq_len, output_size)
    assert jnp.allclose(out, ref_out, atol=1e-4, rtol=1e-4), "output mismatch vs JAX reference"
    assert jnp.allclose(h1T, ref_h1, atol=1e-4, rtol=1e-4), "h1 mismatch vs JAX reference"
    assert jnp.allclose(h2T, ref_h2, atol=1e-4, rtol=1e-4), "h2 mismatch vs JAX reference"

    print("KERNEL_OK")
</pallas_src>

<mosaic_0001>
module attributes {stable_mosaic.version = 11 : i64} {
  func.func @_gru_forward_kernel(%arg0: memref<8x16xf32, #tpu.memory_space<vmem>>, %arg1: memref<1x64xf32, #tpu.memory_space<vmem>>, %arg2: memref<16x192xf32, #tpu.memory_space<vmem>>, %arg3: memref<1x192xf32, #tpu.memory_space<vmem>>, %arg4: memref<64x256xf32, #tpu.memory_space<vmem>>, %arg5: memref<1x64xf32, #tpu.memory_space<vmem>>, %arg6: memref<64x16xf32, #tpu.memory_space<vmem>>, %arg7: memref<1x16xf32, #tpu.memory_space<vmem>>, %arg8: memref<8x16xf32, #tpu.memory_space<vmem>>, %arg9: memref<1x32xf32, #tpu.memory_space<vmem>>, %arg10: memref<1x32xf32, #tpu.memory_space<vmem>>, %arg11: memref<8x192xf32, #tpu.memory_space<vmem>>, %arg12: memref<8x64xf32, #tpu.memory_space<vmem>>) attributes {dimension_semantics = [], scalar_prefetch = 0 : i64, scratch_operands = 2 : i64, tpu.core_type = #tpu.core_type<tc>} {
    %c0 = arith.constant 0 : index
    %c0_0 = arith.constant 0 : index
    %0 = vector.load %arg4[%c0, %c0_0] : memref<64x256xf32, #tpu.memory_space<vmem>>, vector<64x256xf32>
    %c0_1 = arith.constant 0 : index
    %c0_2 = arith.constant 0 : index
    %1 = vector.load %arg5[%c0_1, %c0_2] : memref<1x64xf32, #tpu.memory_space<vmem>>, vector<1x64xf32>
    %c0_3 = arith.constant 0 : index
    %c0_4 = arith.constant 0 : index
    %2 = vector.load %arg3[%c0_3, %c0_4] : memref<1x192xf32, #tpu.memory_space<vmem>>, vector<1x192xf32>
    %c0_5 = arith.constant 0 : index
    %c0_6 = arith.constant 0 : index
    %3 = vector.load %arg0[%c0_5, %c0_6] : memref<8x16xf32, #tpu.memory_space<vmem>>, vector<8x16xf32>
    %c0_7 = arith.constant 0 : index
    %c0_8 = arith.constant 0 : index
    %4 = vector.load %arg2[%c0_7, %c0_8] : memref<16x192xf32, #tpu.memory_space<vmem>>, vector<16x192xf32>
    %cst = arith.constant dense<0.000000e+00> : vector<8x192xf32>
    %5 = tpu.matmul %3, %4, %cst {dimension_numbers = #tpu.dot_dimension_numbers<[1], [0], [0], [1], [0, 0, 1, 1], [], []>} : vector<8x16xf32>, vector<16x192xf32>, vector<8x192xf32> -> vector<8x192xf32>
    %6 = vector.broadcast %2 : vector<1x192xf32> to vector<8x192xf32>
    %7 = arith.addf %5, %6 : vector<8x192xf32>
    %c0_9 = arith.constant 0 : index
    %c0_10 = arith.constant 0 : index
    %8 = vector.load %arg11[%c0_9, %c0_10] : memref<8x192xf32, #tpu.memory_space<vmem>>, vector<8x192xf32>
    tpu.vector_store %arg11[%c0_9, %c0_10], %7 {strides = array<i32>} : memref<8x192xf32, #tpu.memory_space<vmem>>, vector<8x192xf32>,
    %9 = tpu.iota {dimensions = array<i32: 1>} : vector<1x64xi32>
    %c32_i32 = arith.constant 32 : i32
    %10 = vector.broadcast %c32_i32 : i32 to vector<1x64xi32>
    %11 = arith.cmpi slt, %9, %10 : vector<1x64xi32>
    %c0_11 = arith.constant 0 : index
    %c0_12 = arith.constant 0 : index
    %12 = vector.load %arg1[%c0_11, %c0_12] : memref<1x64xf32, #tpu.memory_space<vmem>>, vector<1x64xf32>
    %c0_13 = arith.constant 0 : index
    %c0_14 = arith.constant 0 : index
    %13 = vector.load %arg11[%c0_13, %c0_14] : memref<8x192xf32, #tpu.memory_space<vmem>>, vector<1x192xf32>
    %cst_15 = arith.constant dense<0.000000e+00> : vector<1x256xf32>
    %14 = tpu.matmul %12, %0, %cst_15 {dimension_numbers = #tpu.dot_dimension_numbers<[1], [0], [0], [1], [0, 0, 1, 1], [], []>} : vector<1x64xf32>, vector<64x256xf32>, vector<1x256xf32> -> vector<1x256xf32>
    %15 = vector.extract_strided_slice %14 {offsets = [0, 0], sizes = [1, 128], strides = [1, 1]} : vector<1x256xf32> to vector<1x128xf32>
    %16 = vector.extract_strided_slice %13 {offsets = [0, 0], sizes = [1, 128], strides = [1, 1]} : vector<1x192xf32> to vector<1x128xf32>
    %17 = arith.addf %15, %16 : vector<1x128xf32>
    %cst_16 = arith.constant 5.000000e-01 : f32
    %18 = vector.broadcast %cst_16 : f32 to vector<1x128xf32>
    %19 = arith.mulf %18, %17 : vector<1x128xf32>
    %20 = math.tanh %19 : vector<1x128xf32>
    %cst_17 = arith.constant 5.000000e-01 : f32
    %21 = vector.broadcast %cst_17 : f32 to vector<1x128xf32>
    %22 = arith.mulf %21, %20 : vector<1x128xf32>
    %cst_18 = arith.constant 5.000000e-01 : f32
    %23 = vector.broadcast %cst_18 : f32 to vector<1x128xf32>
    %24 = arith.addf %22, %23 : vector<1x128xf32>
    %25 = vector.extract_strided_slice %24 {offsets = [0, 0], sizes = [1, 64], strides = [1, 1]} : vector<1x128xf32> to vector<1x64xf32>
    %26 = vector.extract_strided_slice %24 {offsets = [0, 64], sizes = [1, 64], strides = [1, 1]} : vector<1x128xf32> to vector<1x64xf32>
    %27 = vector.extract_strided_slice %13 {offsets = [0, 128], sizes = [1, 64], strides = [1, 1]} : vector<1x192xf32> to vector<1x64xf32>
    %28 = vector.extract_strided_slice %14 {offsets = [0, 192], sizes = [1, 64], strides = [1, 1]} : vector<1x256xf32> to vector<1x64xf32>
    %29 = arith.addf %27, %28 : vector<1x64xf32>
    %30 = vector.extract_strided_slice %14 {offsets = [0, 128], sizes = [1, 64], strides = [1, 1]} : vector<1x256xf32> to vector<1x64xf32>
    %31 = arith.addf %30, %1 : vector<1x64xf32>
    %32 = arith.mulf %25, %31 : vector<1x64xf32>
    %33 = arith.addf %29, %32 : vector<1x64xf32>
    %34 = math.tanh %33 : vector<1x64xf32>
    %35 = arith.subf %12, %34 : vector<1x64xf32>
    %36 = arith.mulf %26, %35 : vector<1x64xf32>
    %37 = arith.addf %34, %36 : vector<1x64xf32>
    %38 = arith.select %11, %37, %12 : vector<1x64xi1>, vector<1x64xf32>
    %c1_i32 = arith.constant 1 : i32
    %39 = arith.index_cast %c1_i32 : i32 to index
    %c0_19 = arith.constant 0 : index
    %40 = vector.load %arg11[%39, %c0_19] : memref<8x192xf32, #tpu.memory_space<vmem>>, vector<1x192xf32>
    %cst_20 = arith.constant dense<0.000000e+00> : vector<1x256xf32>
    %41 = tpu.matmul %38, %0, %cst_20 {dimension_numbers = #tpu.dot_dimension_numbers<[1], [0], [0], [1], [0, 0, 1, 1], [], []>} : vector<1x64xf32>, vector<64x256xf32>, vector<1x256xf32> -> vector<1x256xf32>
    %42 = vector.extract_strided_slice %41 {offsets = [0, 0], sizes = [1, 128], strides = [1, 1]} : vector<1x256xf32> to vector<1x128xf32>
    %43 = vector.extract_strided_slice %40 {offsets = [0, 0], sizes = [1, 128], strides = [1, 1]} : vector<1x192xf32> to vector<1x128xf32>
    %44 = arith.addf %42, %43 : vector<1x128xf32>
    %cst_21 = arith.constant 5.000000e-01 : f32
    %45 = vector.broadcast %cst_21 : f32 to vector<1x128xf32>
    %46 = arith.mulf %45, %44 : vector<1x128xf32>
    %47 = math.tanh %46 : vector<1x128xf32>
    %cst_22 = arith.constant 5.000000e-01 : f32
    %48 = vector.broadcast %cst_22 : f32 to vector<1x128xf32>
    %49 = arith.mulf %48, %47 : vector<1x128xf32>
    %cst_23 = arith.constant 5.000000e-01 : f32
    %50 = vector.broadcast %cst_23 : f32 to vector<1x128xf32>
    %51 = arith.addf %49, %50 : vector<1x128xf32>
    %52 = vector.extract_strided_slice %51 {offsets = [0, 0], sizes = [1, 64], strides = [1, 1]} : vector<1x128xf32> to vector<1x64xf32>
    %53 = vector.extract_strided_slice %51 {offsets = [0, 64], sizes = [1, 64], strides = [1, 1]} : vector<1x128xf32> to vector<1x64xf32>
    %54 = vector.extract_strided_slice %40 {offsets = [0, 128], sizes = [1, 64], strides = [1, 1]} : vector<1x192xf32> to vector<1x64xf32>
    %55 = vector.extract_strided_slice %41 {offsets = [0, 192], sizes = [1, 64], strides = [1, 1]} : vector<1x256xf32> to vector<1x64xf32>
    %56 = arith.addf %54, %55 : vector<1x64xf32>
    %57 = vector.extract_strided_slice %41 {offsets = [0, 128], sizes = [1, 64], strides = [1, 1]} : vector<1x256xf32> to vector<1x64xf32>
    %58 = arith.addf %57, %1 : vector<1x64xf32>
    %59 = arith.mulf %52, %58 : vector<1x64xf32>
    %60 = arith.addf %56, %59 : vector<1x64xf32>
    %61 = math.tanh %60 : vector<1x64xf32>
    %62 = arith.subf %38, %61 : vector<1x64xf32>
    %63 = arith.mulf %53, %62 : vector<1x64xf32>
    %64 = arith.addf %61, %63 : vector<1x64xf32>
    %c1_i32_24 = arith.constant 1 : i32
    %65 = arith.subi %c1_i32, %c1_i32_24 : i32
    %66 = arith.index_cast %65 : i32 to index
    %c0_25 = arith.constant 0 : index
    %67 = vector.load %arg12[%66, %c0_25] : memref<8x64xf32, #tpu.memory_space<vmem>>, vector<1x64xf32>
    tpu.vector_store %arg12[%66, %c0_25], %64 {strides = array<i32>} : memref<8x64xf32, #tpu.memory_space<vmem>>, vector<1x64xf32>,
    %c2_i32 = arith.constant 2 : i32
    %68 = arith.index_cast %c2_i32 : i32 to index
    %c0_26 = arith.constant 0 : index
    %69 = vector.load %arg11[%68, %c0_26] : memref<8x192xf32, #tpu.memory_space<vmem>>, vector<1x192xf32>
    %cst_27 = arith.constant dense<0.000000e+00> : vector<1x256xf32>
    %70 = tpu.matmul %64, %0, %cst_27 {dimension_numbers = #tpu.dot_dimension_numbers<[1], [0], [0], [1], [0, 0, 1, 1], [], []>} : vector<1x64xf32>, vector<64x256xf32>, vector<1x256xf32> -> vector<1x256xf32>
    %71 = vector.extract_strided_slice %70 {offsets = [0, 0], sizes = [1, 128], strides = [1, 1]} : vector<1x256xf32> to vector<1x128xf32>
    %72 = vector.extract_strided_slice %69 {offsets = [0, 0], sizes = [1, 128], strides = [1, 1]} : vector<1x192xf32> to vector<1x128xf32>
    %73 = arith.addf %71, %72 : vector<1x128xf32>
    %cst_28 = arith.constant 5.000000e-01 : f32
    %74 = vector.broadcast %cst_28 : f32 to vector<1x128xf32>
    %75 = arith.mulf %74, %73 : vector<1x128xf32>
    %76 = math.tanh %75 : vector<1x128xf32>
    %cst_29 = arith.constant 5.000000e-01 : f32
    %77 = vector.broadcast %cst_29 : f32 to vector<1x128xf32>
    %78 = arith.mulf %77, %76 : vector<1x128xf32>
    %cst_30 = arith.constant 5.000000e-01 : f32
    %79 = vector.broadcast %cst_30 : f32 to vector<1x128xf32>
    %80 = arith.addf %78, %79 : vector<1x128xf32>
    %81 = vector.extract_strided_slice %80 {offsets = [0, 0], sizes = [1, 64], strides = [1, 1]} : vector<1x128xf32> to vector<1x64xf32>
    %82 = vector.extract_strided_slice %80 {offsets = [0, 64], sizes = [1, 64], strides = [1, 1]} : vector<1x128xf32> to vector<1x64xf32>
    %83 = vector.extract_strided_slice %69 {offsets = [0, 128], sizes = [1, 64], strides = [1, 1]} : vector<1x192xf32> to vector<1x64xf32>
    %84 = vector.extract_strided_slice %70 {offsets = [0, 192], sizes = [1, 64], strides = [1, 1]} : vector<1x256xf32> to vector<1x64xf32>
    %85 = arith.addf %83, %84 : vector<1x64xf32>
    %86 = vector.extract_strided_slice %70 {offsets = [0, 128], sizes = [1, 64], strides = [1, 1]} : vector<1x256xf32> to vector<1x64xf32>
    %87 = arith.addf %86, %1 : vector<1x64xf32>
    %88 = arith.mulf %81, %87 : vector<1x64xf32>
    %89 = arith.addf %85, %88 : vector<1x64xf32>
    %90 = math.tanh %89 : vector<1x64xf32>
    %91 = arith.subf %64, %90 : vector<1x64xf32>
    %92 = arith.mulf %82, %91 : vector<1x64xf32>
    %93 = arith.addf %90, %92 : vector<1x64xf32>
    %c1_i32_31 = arith.constant 1 : i32
    %94 = arith.subi %c2_i32, %c1_i32_31 : i32
    %95 = arith.index_cast %94 : i32 to index
    %c0_32 = arith.constant 0 : index
    %96 = vector.load %arg12[%95, %c0_32] : memref<8x64xf32, #tpu.memory_space<vmem>>, vector<1x64xf32>
    tpu.vector_store %arg12[%95, %c0_32], %93 {strides = array<i32>} : memref<8x64xf32, #tpu.memory_space<vmem>>, vector<1x64xf32>,
    %c3_i32 = arith.constant 3 : i32
    %97 = arith.index_cast %c3_i32 : i32 to index
    %c0_33 = arith.constant 0 : index
    %98 = vector.load %arg11[%97, %c0_33] : memref<8x192xf32, #tpu.memory_space<vmem>>, vector<1x192xf32>
    %cst_34 = arith.constant dense<0.000000e+00> : vector<1x256xf32>
    %99 = tpu.matmul %93, %0, %cst_34 {dimension_numbers = #tpu.dot_dimension_numbers<[1], [0], [0], [1], [0, 0, 1, 1], [], []>} : vector<1x64xf32>, vector<64x256xf32>, vector<1x256xf32> -> vector<1x256xf32>
    %100 = vector.extract_strided_slice %99 {offsets = [0, 0], sizes = [1, 128], strides = [1, 1]} : vector<1x256xf32> to vector<1x128xf32>
    %101 = vector.extract_strided_slice %98 {offsets = [0, 0], sizes = [1, 128], strides = [1, 1]} : vector<1x192xf32> to vector<1x128xf32>
    %102 = arith.addf %100, %101 : vector<1x128xf32>
    %cst_35 = arith.constant 5.000000e-01 : f32
    %103 = vector.broadcast %cst_35 : f32 to vector<1x128xf32>
    %104 = arith.mulf %103, %102 : vector<1x128xf32>
    %105 = math.tanh %104 : vector<1x128xf32>
    %cst_36 = arith.constant 5.000000e-01 : f32
    %106 = vector.broadcast %cst_36 : f32 to vector<1x128xf32>
    %107 = arith.mulf %106, %105 : vector<1x128xf32>
    %cst_37 = arith.constant 5.000000e-01 : f32
    %108 = vector.broadcast %cst_37 : f32 to vector<1x128xf32>
    %109 = arith.addf %107, %108 : vector<1x128xf32>
    %110 = vector.extract_strided_slice %109 {offsets = [0, 0], sizes = [1, 64], strides = [1, 1]} : vector<1x128xf32> to vector<1x64xf32>
    %111 = vector.extract_strided_slice %109 {offsets = [0, 64], sizes = [1, 64], strides = [1, 1]} : vector<1x128xf32> to vector<1x64xf32>
    %112 = vector.extract_strided_slice %98 {offsets = [0, 128], sizes = [1, 64], strides = [1, 1]} : vector<1x192xf32> to vector<1x64xf32>
    %113 = vector.extract_strided_slice %99 {offsets = [0, 192], sizes = [1, 64], strides = [1, 1]} : vector<1x256xf32> to vector<1x64xf32>
    %114 = arith.addf %112, %113 : vector<1x64xf32>
    %115 = vector.extract_strided_slice %99 {offsets = [0, 128], sizes = [1, 64], strides = [1, 1]} : vector<1x256xf32> to vector<1x64xf32>
    %116 = arith.addf %115, %1 : vector<1x64xf32>
    %117 = arith.mulf %110, %116 : vector<1x64xf32>
    %118 = arith.addf %114, %117 : vector<1x64xf32>
    %119 = math.tanh %118 : vector<1x64xf32>
    %120 = arith.subf %93, %119 : vector<1x64xf32>
    %121 = arith.mulf %111, %120 : vector<1x64xf32>
    %122 = arith.addf %119, %121 : vector<1x64xf32>
    %c1_i32_38 = arith.constant 1 : i32
    %123 = arith.subi %c3_i32, %c1_i32_38 : i32
    %124 = arith.index_cast %123 : i32 to index
    %c0_39 = arith.constant 0 : index
    %125 = vector.load %arg12[%124, %c0_39] : memref<8x64xf32, #tpu.memory_space<vmem>>, vector<1x64xf32>
    tpu.vector_store %arg12[%124, %c0_39], %122 {strides = array<i32>} : memref<8x64xf32, #tpu.memory_space<vmem>>, vector<1x64xf32>,
    %c4_i32 = arith.constant 4 : i32
    %126 = arith.index_cast %c4_i32 : i32 to index
    %c0_40 = arith.constant 0 : index
    %127 = vector.load %arg11[%126, %c0_40] : memref<8x192xf32, #tpu.memory_space<vmem>>, vector<1x192xf32>
    %cst_41 = arith.constant dense<0.000000e+00> : vector<1x256xf32>
    %128 = tpu.matmul %122, %0, %cst_41 {dimension_numbers = #tpu.dot_dimension_numbers<[1], [0], [0], [1], [0, 0, 1, 1], [], []>} : vector<1x64xf32>, vector<64x256xf32>, vector<1x256xf32> -> vector<1x256xf32>
    %129 = vector.extract_strided_slice %128 {offsets = [0, 0], sizes = [1, 128], strides = [1, 1]} : vector<1x256xf32> to vector<1x128xf32>
    %130 = vector.extract_strided_slice %127 {offsets = [0, 0], sizes = [1, 128], strides = [1, 1]} : vector<1x192xf32> to vector<1x128xf32>
    %131 = arith.addf %129, %130 : vector<1x128xf32>
    %cst_42 = arith.constant 5.000000e-01 : f32
    %132 = vector.broadcast %cst_42 : f32 to vector<1x128xf32>
    %133 = arith.mulf %132, %131 : vector<1x128xf32>
    %134 = math.tanh %133 : vector<1x128xf32>
    %cst_43 = arith.constant 5.000000e-01 : f32
    %135 = vector.broadcast %cst_43 : f32 to vector<1x128xf32>
    %136 = arith.mulf %135, %134 : vector<1x128xf32>
    %cst_44 = arith.constant 5.000000e-01 : f32
    %137 = vector.broadcast %cst_44 : f32 to vector<1x128xf32>
    %138 = arith.addf %136, %137 : vector<1x128xf32>
    %139 = vector.extract_strided_slice %138 {offsets = [0, 0], sizes = [1, 64], strides = [1, 1]} : vector<1x128xf32> to vector<1x64xf32>
    %140 = vector.extract_strided_slice %138 {offsets = [0, 64], sizes = [1, 64], strides = [1, 1]} : vector<1x128xf32> to vector<1x64xf32>
    %141 = vector.extract_strided_slice %127 {offsets = [0, 128], sizes = [1, 64], strides = [1, 1]} : vector<1x192xf32> to vector<1x64xf32>
    %142 = vector.extract_strided_slice %128 {offsets = [0, 192], sizes = [1, 64], strides = [1, 1]} : vector<1x256xf32> to vector<1x64xf32>
    %143 = arith.addf %141, %142 : vector<1x64xf32>
    %144 = vector.extract_strided_slice %128 {offsets = [0, 128], sizes = [1, 64], strides = [1, 1]} : vector<1x256xf32> to vector<1x64xf32>
    %145 = arith.addf %144, %1 : vector<1x64xf32>
    %146 = arith.mulf %139, %145 : vector<1x64xf32>
    %147 = arith.addf %143, %146 : vector<1x64xf32>
    %148 = math.tanh %147 : vector<1x64xf32>
    %149 = arith.subf %122, %148 : vector<1x64xf32>
    %150 = arith.mulf %140, %149 : vector<1x64xf32>
    %151 = arith.addf %148, %150 : vector<1x64xf32>
    %c1_i32_45 = arith.constant 1 : i32
    %152 = arith.subi %c4_i32, %c1_i32_45 : i32
    %153 = arith.index_cast %152 : i32 to index
    %c0_46 = arith.constant 0 : index
    %154 = vector.load %arg12[%153, %c0_46] : memref<8x64xf32, #tpu.memory_space<vmem>>, vector<1x64xf32>
    tpu.vector_store %arg12[%153, %c0_46], %151 {strides = array<i32>} : memref<8x64xf32, #tpu.memory_space<vmem>>, vector<1x64xf32>,
    %c5_i32 = arith.constant 5 : i32
    %155 = arith.index_cast %c5_i32 : i32 to index
    %c0_47 = arith.constant 0 : index
    %156 = vector.load %arg11[%155, %c0_47] : memref<8x192xf32, #tpu.memory_space<vmem>>, vector<1x192xf32>
    %cst_48 = arith.constant dense<0.000000e+00> : vector<1x256xf32>
    %157 = tpu.matmul %151, %0, %cst_48 {dimension_numbers = #tpu.dot_dimension_numbers<[1], [0], [0], [1], [0, 0, 1, 1], [], []>} : vector<1x64xf32>, vector<64x256xf32>, vector<1x256xf32> -> vector<1x256xf32>
    %158 = vector.extract_strided_slice %157 {offsets = [0, 0], sizes = [1, 128], strides = [1, 1]} : vector<1x256xf32> to vector<1x128xf32>
    %159 = vector.extract_strided_slice %156 {offsets = [0, 0], sizes = [1, 128], strides = [1, 1]} : vector<1x192xf32> to vector<1x128xf32>
    %160 = arith.addf %158, %159 : vector<1x128xf32>
    %cst_49 = arith.constant 5.000000e-01 : f32
    %161 = vector.broadcast %cst_49 : f32 to vector<1x128xf32>
    %162 = arith.mulf %161, %160 : vector<1x128xf32>
    %163 = math.tanh %162 : vector<1x128xf32>
    %cst_50 = arith.constant 5.000000e-01 : f32
    %164 = vector.broadcast %cst_50 : f32 to vector<1x128xf32>
    %165 = arith.mulf %164, %163 : vector<1x128xf32>
    %cst_51 = arith.constant 5.000000e-01 : f32
    %166 = vector.broadcast %cst_51 : f32 to vector<1x128xf32>
    %167 = arith.addf %165, %166 : vector<1x128xf32>
    %168 = vector.extract_strided_slice %167 {offsets = [0, 0], sizes = [1, 64], strides = [1, 1]} : vector<1x128xf32> to vector<1x64xf32>
    %169 = vector.extract_strided_slice %167 {offsets = [0, 64], sizes = [1, 64], strides = [1, 1]} : vector<1x128xf32> to vector<1x64xf32>
    %170 = vector.extract_strided_slice %156 {offsets = [0, 128], sizes = [1, 64], strides = [1, 1]} : vector<1x192xf32> to vector<1x64xf32>
    %171 = vector.extract_strided_slice %157 {offsets = [0, 192], sizes = [1, 64], strides = [1, 1]} : vector<1x256xf32> to vector<1x64xf32>
    %172 = arith.addf %170, %171 : vector<1x64xf32>
    %173 = vector.extract_strided_slice %157 {offsets = [0, 128], sizes = [1, 64], strides = [1, 1]} : vector<1x256xf32> to vector<1x64xf32>
    %174 = arith.addf %173, %1 : vector<1x64xf32>
    %175 = arith.mulf %168, %174 : vector<1x64xf32>
    %176 = arith.addf %172, %175 : vector<1x64xf32>
    %177 = math.tanh %176 : vector<1x64xf32>
    %178 = arith.subf %151, %177 : vector<1x64xf32>
    %179 = arith.mulf %169, %178 : vector<1x64xf32>
    %180 = arith.addf %177, %179 : vector<1x64xf32>
    %c1_i32_52 = arith.constant 1 : i32
    %181 = arith.subi %c5_i32, %c1_i32_52 : i32
    %182 = arith.index_cast %181 : i32 to index
    %c0_53 = arith.constant 0 : index
    %183 = vector.load %arg12[%182, %c0_53] : memref<8x64xf32, #tpu.memory_space<vmem>>, vector<1x64xf32>
    tpu.vector_store %arg12[%182, %c0_53], %180 {strides = array<i32>} : memref<8x64xf32, #tpu.memory_space<vmem>>, vector<1x64xf32>,
    %c6_i32 = arith.constant 6 : i32
    %184 = arith.index_cast %c6_i32 : i32 to index
    %c0_54 = arith.constant 0 : index
    %185 = vector.load %arg11[%184, %c0_54] : memref<8x192xf32, #tpu.memory_space<vmem>>, vector<1x192xf32>
    %cst_55 = arith.constant dense<0.000000e+00> : vector<1x256xf32>
    %186 = tpu.matmul %180, %0, %cst_55 {dimension_numbers = #tpu.dot_dimension_numbers<[1], [0], [0], [1], [0, 0, 1, 1], [], []>} : vector<1x64xf32>, vector<64x256xf32>, vector<1x256xf32> -> vector<1x256xf32>
    %187 = vector.extract_strided_slice %186 {offsets = [0, 0], sizes = [1, 128], strides = [1, 1]} : vector<1x256xf32> to vector<1x128xf32>
    %188 = vector.extract_strided_slice %185 {offsets = [0, 0], sizes = [1, 128], strides = [1, 1]} : vector<1x192xf32> to vector<1x128xf32>
    %189 = arith.addf %187, %188 : vector<1x128xf32>
    %cst_56 = arith.constant 5.000000e-01 : f32
    %190 = vector.broadcast %cst_56 : f32 to vector<1x128xf32>
    %191 = arith.mulf %190, %189 : vector<1x128xf32>
    %192 = math.tanh %191 : vector<1x128xf32>
    %cst_57 = arith.constant 5.000000e-01 : f32
    %193 = vector.broadcast %cst_57 : f32 to vector<1x128xf32>
    %194 = arith.mulf %193, %192 : vector<1x128xf32>
    %cst_58 = arith.constant 5.000000e-01 : f32
    %195 = vector.broadcast %cst_58 : f32 to vector<1x128xf32>
    %196 = arith.addf %194, %195 : vector<1x128xf32>
    %197 = vector.extract_strided_slice %196 {offsets = [0, 0], sizes = [1, 64], strides = [1, 1]} : vector<1x128xf32> to vector<1x64xf32>
    %198 = vector.extract_strided_slice %196 {offsets = [0, 64], sizes = [1, 64], strides = [1, 1]} : vector<1x128xf32> to vector<1x64xf32>
    %199 = vector.extract_strided_slice %185 {offsets = [0, 128], sizes = [1, 64], strides = [1, 1]} : vector<1x192xf32> to vector<1x64xf32>
    %200 = vector.extract_strided_slice %186 {offsets = [0, 192], sizes = [1, 64], strides = [1, 1]} : vector<1x256xf32> to vector<1x64xf32>
    %201 = arith.addf %199, %200 : vector<1x64xf32>
    %202 = vector.extract_strided_slice %186 {offsets = [0, 128], sizes = [1, 64], strides = [1, 1]} : vector<1x256xf32> to vector<1x64xf32>
    %203 = arith.addf %202, %1 : vector<1x64xf32>
    %204 = arith.mulf %197, %203 : vector<1x64xf32>
    %205 = arith.addf %201, %204 : vector<1x64xf32>
    %206 = math.tanh %205 : vector<1x64xf32>
    %207 = arith.subf %180, %206 : vector<1x64xf32>
    %208 = arith.mulf %198, %207 : vector<1x64xf32>
    %209 = arith.addf %206, %208 : vector<1x64xf32>
    %c1_i32_59 = arith.constant 1 : i32
    %210 = arith.subi %c6_i32, %c1_i32_59 : i32
    %211 = arith.index_cast %210 : i32 to index
    %c0_60 = arith.constant 0 : index
    %212 = vector.load %arg12[%211, %c0_60] : memref<8x64xf32, #tpu.memory_space<vmem>>, vector<1x64xf32>
    tpu.vector_store %arg12[%211, %c0_60], %209 {strides = array<i32>} : memref<8x64xf32, #tpu.memory_space<vmem>>, vector<1x64xf32>,
    %c7_i32 = arith.constant 7 : i32
    %213 = arith.index_cast %c7_i32 : i32 to index
    %c0_61 = arith.constant 0 : index
    %214 = vector.load %arg11[%213, %c0_61] : memref<8x192xf32, #tpu.memory_space<vmem>>, vector<1x192xf32>
    %cst_62 = arith.constant dense<0.000000e+00> : vector<1x256xf32>
    %215 = tpu.matmul %209, %0, %cst_62 {dimension_numbers = #tpu.dot_dimension_numbers<[1], [0], [0], [1], [0, 0, 1, 1], [], []>} : vector<1x64xf32>, vector<64x256xf32>, vector<1x256xf32> -> vector<1x256xf32>
    %216 = vector.extract_strided_slice %215 {offsets = [0, 0], sizes = [1, 128], strides = [1, 1]} : vector<1x256xf32> to vector<1x128xf32>
    %217 = vector.extract_strided_slice %214 {offsets = [0, 0], sizes = [1, 128], strides = [1, 1]} : vector<1x192xf32> to vector<1x128xf32>
    %218 = arith.addf %216, %217 : vector<1x128xf32>
    %cst_63 = arith.constant 5.000000e-01 : f32
    %219 = vector.broadcast %cst_63 : f32 to vector<1x128xf32>
    %220 = arith.mulf %219, %218 : vector<1x128xf32>
    %221 = math.tanh %220 : vector<1x128xf32>
    %cst_64 = arith.constant 5.000000e-01 : f32
    %222 = vector.broadcast %cst_64 : f32 to vector<1x128xf32>
    %223 = arith.mulf %222, %221 : vector<1x128xf32>
    %cst_65 = arith.constant 5.000000e-01 : f32
    %224 = vector.broadcast %cst_65 : f32 to vector<1x128xf32>
    %225 = arith.addf %223, %224 : vector<1x128xf32>
    %226 = vector.extract_strided_slice %225 {offsets = [0, 0], sizes = [1, 64], strides = [1, 1]} : vector<1x128xf32> to vector<1x64xf32>
    %227 = vector.extract_strided_slice %225 {offsets = [0, 64], sizes = [1, 64], strides = [1, 1]} : vector<1x128xf32> to vector<1x64xf32>
    %228 = vector.extract_strided_slice %214 {offsets = [0, 128], sizes = [1, 64], strides = [1, 1]} : vector<1x192xf32> to vector<1x64xf32>
    %229 = vector.extract_strided_slice %215 {offsets = [0, 192], sizes = [1, 64], strides = [1, 1]} : vector<1x256xf32> to vector<1x64xf32>
    %230 = arith.addf %228, %229 : vector<1x64xf32>
    %231 = vector.extract_strided_slice %215 {offsets = [0, 128], sizes = [1, 64], strides = [1, 1]} : vector<1x256xf32> to vector<1x64xf32>
    %232 = arith.addf %231, %1 : vector<1x64xf32>
    %233 = arith.mulf %226, %232 : vector<1x64xf32>
    %234 = arith.addf %230, %233 : vector<1x64xf32>
    %235 = math.tanh %234 : vector<1x64xf32>
    %236 = arith.subf %209, %235 : vector<1x64xf32>
    %237 = arith.mulf %227, %236 : vector<1x64xf32>
    %238 = arith.addf %235, %237 : vector<1x64xf32>
    %c1_i32_66 = arith.constant 1 : i32
    %239 = arith.subi %c7_i32, %c1_i32_66 : i32
    %240 = arith.index_cast %239 : i32 to index
    %c0_67 = arith.constant 0 : index
    %241 = vector.load %arg12[%240, %c0_67] : memref<8x64xf32, #tpu.memory_space<vmem>>, vector<1x64xf32>
    tpu.vector_store %arg12[%240, %c0_67], %238 {strides = array<i32>} : memref<8x64xf32, #tpu.memory_space<vmem>>, vector<1x64xf32>,
    %c7_i32_68 = arith.constant 7 : i32
    %cst_69 = arith.constant dense<0.000000e+00> : vector<1x256xf32>
    %242 = tpu.matmul %238, %0, %cst_69 {dimension_numbers = #tpu.dot_dimension_numbers<[1], [0], [0], [1], [0, 0, 1, 1], [], []>} : vector<1x64xf32>, vector<64x256xf32>, vector<1x256xf32> -> vector<1x256xf32>
    %243 = vector.extract_strided_slice %242 {offsets = [0, 0], sizes = [1, 128], strides = [1, 1]} : vector<1x256xf32> to vector<1x128xf32>
    %244 = vector.extract_strided_slice %2 {offsets = [0, 0], sizes = [1, 128], strides = [1, 1]} : vector<1x192xf32> to vector<1x128xf32>
    %245 = arith.addf %243, %244 : vector<1x128xf32>
    %cst_70 = arith.constant 5.000000e-01 : f32
    %246 = vector.broadcast %cst_70 : f32 to vector<1x128xf32>
    %247 = arith.mulf %246, %245 : vector<1x128xf32>
    %248 = math.tanh %247 : vector<1x128xf32>
    %cst_71 = arith.constant 5.000000e-01 : f32
    %249 = vector.broadcast %cst_71 : f32 to vector<1x128xf32>
    %250 = arith.mulf %249, %248 : vector<1x128xf32>
    %cst_72 = arith.constant 5.000000e-01 : f32
    %251 = vector.broadcast %cst_72 : f32 to vector<1x128xf32>
    %252 = arith.addf %250, %251 : vector<1x128xf32>
    %253 = vector.extract_strided_slice %252 {offsets = [0, 0], sizes = [1, 64], strides = [1, 1]} : vector<1x128xf32> to vector<1x64xf32>
    %254 = vector.extract_strided_slice %252 {offsets = [0, 64], sizes = [1, 64], strides = [1, 1]} : vector<1x128xf32> to vector<1x64xf32>
    %255 = vector.extract_strided_slice %2 {offsets = [0, 128], sizes = [1, 64], strides = [1, 1]} : vector<1x192xf32> to vector<1x64xf32>
    %256 = vector.extract_strided_slice %242 {offsets = [0, 192], sizes = [1, 64], strides = [1, 1]} : vector<1x256xf32> to vector<1x64xf32>
    %257 = arith.addf %255, %256 : vector<1x64xf32>
    %258 = vector.extract_strided_slice %242 {offsets = [0, 128], sizes = [1, 64], strides = [1, 1]} : vector<1x256xf32> to vector<1x64xf32>
    %259 = arith.addf %258, %1 : vector<1x64xf32>
    %260 = arith.mulf %253, %259 : vector<1x64xf32>
    %261 = arith.addf %257, %260 : vector<1x64xf32>
    %262 = math.tanh %261 : vector<1x64xf32>
    %263 = arith.subf %238, %262 : vector<1x64xf32>
    %264 = arith.mulf %254, %263 : vector<1x64xf32>
    %265 = arith.addf %262, %264 : vector<1x64xf32>
    %c7 = arith.constant 7 : index
    %c0_73 = arith.constant 0 : index
    %266 = vector.load %arg12[%c7, %c0_73] : memref<8x64xf32, #tpu.memory_space<vmem>>, vector<1x64xf32>
    tpu.vector_store %arg12[%c7, %c0_73], %265 {strides = array<i32>} : memref<8x64xf32, #tpu.memory_space<vmem>>, vector<1x64xf32>,
    %267 = arith.select %11, %238, %265 : vector<1x64xi1>, vector<1x64xf32>
    %c0_74 = arith.constant 0 : index
    %c0_75 = arith.constant 0 : index
    %268 = vector.load %arg12[%c0_74, %c0_75] : memref<8x64xf32, #tpu.memory_space<vmem>>, vector<8x64xf32>
    %c0_76 = arith.constant 0 : index
    %c0_77 = arith.constant 0 : index
    %269 = vector.load %arg6[%c0_76, %c0_77] : memref<64x16xf32, #tpu.memory_space<vmem>>, vector<64x16xf32>
    %cst_78 = arith.constant dense<0.000000e+00> : vector<8x16xf32>
    %270 = tpu.matmul %268, %269, %cst_78 {dimension_numbers = #tpu.dot_dimension_numbers<[1], [0], [0], [1], [0, 0, 1, 1], [], []>} : vector<8x64xf32>, vector<64x16xf32>, vector<8x16xf32> -> vector<8x16xf32>
    %c0_79 = arith.constant 0 : index
    %c0_80 = arith.constant 0 : index
    %271 = vector.load %arg7[%c0_79, %c0_80] : memref<1x16xf32, #tpu.memory_space<vmem>>, vector<1x16xf32>
    %272 = vector.broadcast %271 : vector<1x16xf32> to vector<8x16xf32>
    %273 = arith.addf %270, %272 : vector<8x16xf32>
    %cst_81 = arith.constant dense<0xFF800000> : vector<8xf32>
    %274 = vector.multi_reduction <maximumf>, %273, %cst_81 [1] : vector<8x16xf32> to vector<8xf32>
    %275 = vector.shape_cast %274 : vector<8xf32> to vector<8x1xf32>
    %276 = vector.broadcast %275 : vector<8x1xf32> to vector<8x16xf32>
    %277 = arith.subf %273, %276 : vector<8x16xf32>
    %278 = math.exp %277 : vector<8x16xf32>
    %cst_82 = arith.constant dense<0.000000e+00> : vector<8xf32>
    %279 = vector.multi_reduction <add>, %278, %cst_82 [1] : vector<8x16xf32> to vector<8xf32>
    %280 = vector.shape_cast %279 : vector<8xf32> to vector<8x1xf32>
    %281 = math.log %280 : vector<8x1xf32>
    %282 = vector.broadcast %281 : vector<8x1xf32> to vector<8x16xf32>
    %283 = arith.subf %277, %282 : vector<8x16xf32>
    %c0_83 = arith.constant 0 : index
    %c0_84 = arith.constant 0 : index
    %284 = vector.load %arg8[%c0_83, %c0_84] : memref<8x16xf32, #tpu.memory_space<vmem>>, vector<8x16xf32>
    tpu.vector_store %arg8[%c0_83, %c0_84], %283 {strides = array<i32>} : memref<8x16xf32, #tpu.memory_space<vmem>>, vector<8x16xf32>,
    %285 = vector.extract_strided_slice %267 {offsets = [0, 0], sizes = [1, 32], strides = [1, 1]} : vector<1x64xf32> to vector<1x32xf32>
    %c0_85 = arith.constant 0 : index
    %c0_86 = arith.constant 0 : index
    %286 = vector.load %arg9[%c0_85, %c0_86] : memref<1x32xf32, #tpu.memory_space<vmem>>, vector<1x32xf32>
    tpu.vector_store %arg9[%c0_85, %c0_86], %285 {strides = array<i32>} : memref<1x32xf32, #tpu.memory_space<vmem>>, vector<1x32xf32>,
    %287 = vector.extract_strided_slice %267 {offsets = [0, 32], sizes = [1, 32], strides = [1, 1]} : vector<1x64xf32> to vector<1x32xf32>
    %c0_87 = arith.constant 0 : index
    %c0_88 = arith.constant 0 : index
    %288 = vector.load %arg10[%c0_87, %c0_88] : memref<1x32xf32, #tpu.memory_space<vmem>>, vector<1x32xf32>
    tpu.vector_store %arg10[%c0_87, %c0_88], %287 {strides = array<i32>} : memref<1x32xf32, #tpu.memory_space<vmem>>, vector<1x32xf32>,
    return
  }
}

</mosaic_0001>

<bundles_post_ra>
// kernel: gru_forward.1
= control target key start
LH: loop header
LB: loop body
LE: loop exit
PB: predicated region body
PF: predicated region fallthrough
CT: control target
= control target key end

     0   :  { %16 = vsyncpa [#allocation5], 0  ;;  %s2283_s0 = inlined_call_operand.vmem [shape: f32[8,16], index: 0, kind: input, shape index: {}]   ;;  %s2284_s1 = inlined_call_operand.vmem [shape: f32[1,64], index: 1, kind: input, shape index: {}]   ;;  %s2285_s2 = inlined_call_operand.vmem [shape: f32[16,192], index: 2, kind: input, shape index: {}]   ;;  %s2286_s3 = inlined_call_operand.vmem [shape: f32[1,192], index: 3, kind: input, shape index: {}]   ;;  %s2287_s4 = inlined_call_operand.hbm [shape: f32[64,256], index: 4, kind: input, shape index: {}]   ;;  %s2288_s5 = inlined_call_operand.vmem [shape: f32[1,64], index: 5, kind: input, shape index: {}]   ;;  %s2289_s6 = inlined_call_operand.vmem [shape: f32[64,16], index: 6, kind: input, shape index: {}]   ;;  %s2290_s7 = inlined_call_operand.vmem [shape: f32[1,16], index: 7, kind: input, shape index: {}]   ;;  %s2291_s8 = inlined_call_operand.hbm [shape: f32[8,16], index: 8, kind: output, shape index: {0}]   ;;  %s2292_s9 = inlined_call_operand.hbm [shape: f32[1,32], index: 9, kind: output, shape index: {1}]   ;;  %s2293_s10 = inlined_call_operand.hbm [shape: f32[1,32], index: 10, kind: output, shape index: {2}]  }
   0x1   :  { %17 = vsyncpa [#allocation6], 0 }
   0x2   :  { %18 = vsyncpa [#allocation9], 0  ;;  %s1888_s13 = smov [#allocation4]   ;;  %s1794_s17 = scalar_lea.hbm %s2287_s4, 2048 }
   0x3   :  { %s32_s14 = sshll.u32 %s1888_s13, 4  ;;  %p1795_p0 = scmp.ne.s32.totalorder %s2287_s4, %s1794_s17  ;;  %s33_s14 = int_to_ptr.vmem [resolvable:$true] %s32_s14 }
   0x4   :  { %p1798_p1 = scmp.lt.u32.totalorder %s1794_s17, %s2287_s4 }
   0x6   :  { %p1800_p2 = pnand %p1798_p1, %p1795_p0 }
   0x8   :  { %1803 = shalt.err (!%p1800_p2)
}
   0x9   :  { %s1804_s22 = scalar_lea.vmem %s33_s14, 2048  ;;  %p1809_p4 = scmp.lt.s32.totalorder %s33_s14, %s33_s14 }
   0xa   :  { %p1805_p3 = scmp.ne.s32.totalorder %s33_s14, %s1804_s22  ;;  %p1810_p5 = scmp.lt.s32.totalorder %s1804_s22, %s1804_s22 }
   0xc   :  { %p1811_p6 = por %p1810_p5, %p1809_p4 }
   0xe   :  { %p1812_p7 = pnand %p1811_p6, %p1805_p3 }
  0x10   :  { %1815 = shalt.err (!%p1812_p7)
}
  0x11   :  { %s1889_s23 = smov 256   ;;  %s1890_s24 = smov 16  }
  0x12   :  { %38 = dma.hbm_to_vmem [thread:$0]  %s2287_s4, 2048, %s33_s14, [#allocation5], %s1889_s23, %s1889_s23, %s1890_s24  }
  0x13   :  { %1882 = dma.done.wait [#allocation5], 2048  }
  0x14   :  { %1883 = vsyncadd [#allocation5], 4294965248  ;;  %v1891_v0 = vmov 0.0   ;;  %v49_v1 = vld [vmem:[#allocation4 + $0x8] sm:$0xff]  ;;  %v51_v2 = vld [vmem:[#allocation4 + $0x18] sm:$0xff]  ;;  %vm82_vm0 = vcmask 130048   ;;  %v72_v33 = vlaneseq }
  0x15   :  { %150 = vmatprep.mubr.f32.mxu0 %v1891_v0  ;;  %232 = vmatprep.mubr.f32.mxu1 %v1891_v0  ;;  %v68_v3 = vld [vmem:[%s2285_s2 + $0x8] sm:$0xff]  ;;  %v1972_v4 = vpack.c.bf16 %v51_v2, %v49_v1  ;;  %v70_v5 = vld [vmem:[%s2285_s2 + $0x18] sm:$0xff]  ;;  %v67_v10 = vld [vmem:[%s2285_s2] sm:$0xff]  ;;  %vm158_vm1 = vcmask 523264   ;;  %v1892_v42 = vmov 1966171168  }
  0x16   :  { %v48_v6 = vld [vmem:[#allocation4] sm:$0xff]  ;;  %v50_v7 = vld [vmem:[#allocation4 + $0x10] sm:$0xff]  ;;  %v1582_v8 = vpack.c.bf16 %v70_v5, %v68_v3  ;;  %v69_v11 = vld [vmem:[%s2285_s2 + $0x10] sm:$0xff]  ;;  %v73_v34 = vshrl.u32 %v72_v33, 7  ;;  %v249_v43 = vunpack.c.l.s4 %v1892_v42  ;;  %vm432_vm3 = vcmask 516096   ;;  %s1896_s14 = smov 96  }
  0x17   :  { %v1977_v9 = vpack.c.bf16 %v50_v7, %v48_v6  ;;  %v53_v12 = vld [vmem:[#allocation4 + $0x28] sm:$0xff]  ;;  %1587 = vmatprep.subr.bf16.mxu1 %v1972_v4  ;;  %v1584_v13 = vpack.c.bf16 %v69_v11, %v67_v10  ;;  %v55_v14 = vld [vmem:[#allocation4 + $0x38] sm:$0xff]  ;;  %v52_v15 = vld [vmem:[#allocation4 + $0x20] sm:$0xff]  ;;  %v2064_v11 = vand.u32 127, %v72_v33  ;;  %vm1895_vm4 = vmmov 0   ;;  %s1897_s15 = smov [#allocation8]  }
  0x18   :  { %1583 = vmatprep.subr.bf16.mxu0 %v1582_v8  ;;  %v1987_v16 = vpack.c.bf16 %v55_v14, %v53_v12  ;;  %v54_v17 = vld [vmem:[#allocation4 + $0x30] sm:$0xff]  ;;  %v57_v18 = vld [vmem:[#allocation4 + $0x48] sm:$0xff]  ;;  %v59_v19 = vld [vmem:[#allocation4 + $0x58] sm:$0xff]  ;;  %v2036_v35 = vsub.s32 0, %v73_v34  ;;  %v78_v37 = vsub.s32 1, %v73_v34  ;;  %v250_v46 = vunpack.c.0.s8 %v249_v43 }
  0x19   :  { %1589 = vmatpush1.bf16.msra.mxu1 %v1977_v9  ;;  %1585 = vmatpush1.bf16.msra.mxu0 %v1584_v13  ;;  %v66_v20 = vld [vmem:[%s2283_s0] sm:$0xff]  ;;  %v1992_v21 = vpack.c.bf16 %v54_v17, %v52_v15  ;;  %v1994_v22 = vpack.c.bf16 %v59_v19, %v57_v18  ;;  %v56_v23 = vld [vmem:[#allocation4 + $0x40] sm:$0xff]  ;;  %v58_v24 = vld [vmem:[#allocation4 + $0x50] sm:$0xff]  ;;  %vm162_vm2 = vcmp.lt.s32.totalorder %v2064_v11, 32  ;;  %vm1493_vm5 = vcmask 253952   ;;  %s1516_s0 = sshll.u32 %s1897_s15, 4  ;;  %s1517_s0 = int_to_ptr.vmem [resolvable:$true] %s1516_s0 }
  0x1a   :  { %1591 = vmatprep.subr.bf16.mxu1 %v1987_v16  ;;  %v61_v25 = vld [vmem:[#allocation4 + $0x68] sm:$0xff]  ;;  %v63_v26 = vld [vmem:[#allocation4 + $0x78] sm:$0xff]  ;;  %1603 = vmatprep.subr.bf16.mxu0 %v1972_v4  ;;  %v2000_v27 = vpack.c.bf16 %v58_v24, %v56_v23  ;;  %v60_v29 = vld [vmem:[#allocation4 + $0x60] sm:$0xff]  ;;  %v2047_v47 = vsub.s32 %v250_v46, %v73_v34  ;;  %s1820_s2 = scalar_lea.vmem %s1517_s0, 32  ;;  %p1821_p9 = scmp.lt.s32.totalorder %s1517_s0, %s1517_s0 }
  0x1b   :  { %v2003_v28 = vpack.c.bf16 %v63_v26, %v61_v25  ;;  %v62_v30 = vld [vmem:[#allocation4 + $0x70] sm:$0xff]  ;;  %v2018_v32 = vld [vmem:[%s2284_s1] sm:$0x1] }
  0x1c   :  { %1542 = vmatmul.mubr.msk.f32.vlgmr.msra.gmra.mrb[0].mxu0 %vm82_vm0, %v66_v20  ;;  %v2009_v31 = vpack.c.bf16 %v62_v30, %v60_v29  ;;  %v2041_v36 = vld [vmem:[%s2286_s3] sm:$0x3]  ;;  %s1893_s3 = smov 64  }
  0x1d   :  { %1593 = vmatpush1.bf16.msra.mxu1 %v1992_v21  ;;  %1605 = vmatpush1.bf16.msra.mxu0 %v1977_v9  ;;  %v75_v38 = vrot.slane %v2041_v36, %v2036_v35  ;;  %v79_v39 = vrot.slane %v2041_v36, %v78_v37  ;;  %v2055_v57 = vld [vmem:[%s2288_s5] sm:$0x1] }
  0x1e   :  { %1595 = vmatprep.subr.bf16.mxu1 %v1994_v22  ;;  %1607 = vmatprep.subr.bf16.mxu0 %v1987_v16 }
  0x1f   :  { %369 = vmatprep.mubr.f32.mxu0 %v1891_v0 }
  0x21   :  { %1597 = vmatpush1.bf16.msra.mxu1 %v2000_v27  ;;  %1609 = vmatpush1.bf16.msra.mxu0 %v1992_v21 }
  0x22   :  { %1599 = vmatprep.subr.bf16.mxu1 %v2003_v28  ;;  %1611 = vmatprep.subr.bf16.mxu0 %v1994_v22 }
  0x25   :  { %1601 = vmatpush1.bf16.msra.mxu1 %v2009_v31  ;;  %1613 = vmatpush1.bf16.msra.mxu0 %v2000_v27 }
  0x26   :  { %1619 = vmatprep.subr.bf16.mxu1 %v1972_v4  ;;  %1615 = vmatprep.subr.bf16.mxu0 %v2003_v28 }
  0x28   :  { %1543 = vmatmul.mubr.msk.f32.vlgmr.msra.gmra.mrb[0].mxu1 %vm158_vm1, %v2018_v32 }
  0x29   :  { %1621 = vmatpush1.bf16.msra.mxu1 %v1977_v9  ;;  %503 = vmatprep.mubr.f32.mxu1 %v1891_v0 }
  0x2a   :  { %1617 = vmatpush1.bf16.msra.mxu0 %v2009_v31  ;;  %1623 = vmatprep.subr.bf16.mxu1 %v1987_v16 }
  0x2b   :  { %1635 = vmatprep.subr.bf16.mxu0 %v1972_v4 }
  0x2d   :  { %1625 = vmatpush1.bf16.msra.mxu1 %v1992_v21 }
  0x2e   :  { %1627 = vmatprep.subr.bf16.mxu1 %v1994_v22 }
  0x31   :  { %1629 = vmatpush1.bf16.msra.mxu1 %v2000_v27 }
  0x32   :  { %1631 = vmatprep.subr.bf16.mxu1 %v2003_v28 }
  0x35   :  { %1633 = vmatpush1.bf16.msra.mxu1 %v2009_v31 }
  0x36   :  { %1651 = vmatprep.subr.bf16.mxu1 %v1972_v4 }
  0xef   :  { %v152_v40 = vpop.f32.mrb[0].mxu0 }
  0xf0   :  { %v153_v41 = vadd.f32 %v152_v40, %v75_v38  ;;  %v154_v44 = vpop.f32.mrb[1].mxu0 }
  0xf1   :  { %v155_v45 = vadd.f32 %v154_v44, %v79_v39 }
  0xf2   :  { %157 = vst [vmem:[#allocation2] sm:$0xff] %v153_v41 }
  0xf3   :  { %159 = vst.msk [vmem:[#allocation2 + $0x8] sm:$0xff] %vm158_vm1, %v155_v45 }
  0xfa   :  { %v164_v52 = vld [vmem:[#allocation2] ss:$8 sm:$0x3]  ;;  %v301_v20 = vld [vmem:[#allocation2 + $0x1] ss:$8 sm:$0x3] }
  0xfb   :  { %v234_v48 = vpop.f32.mrb[0].mxu1  ;;  %v245_v60 = vrot.slane %v164_v52, 1 }
  0xfc   :  { %v236_v49 = vpop.f32.mrb[1].mxu1  ;;  %v239_v53 = vadd.f32 %v234_v48, %v164_v52  ;;  %v435_v52 = vld [vmem:[#allocation2 + $0x2] ss:$8 sm:$0x3] }
  0xfd   :  { %v254_v50 = vrot.slane %v236_v49, %v2047_v47  ;;  %v266_v59 = vadd.f32 %v236_v49, %v2055_v57 }
  0xfe   :  { %v240_v54 = vmul.f32 0.5, %v239_v53 }
  0xff   :  { %v261_v51 = vrot.slane %v254_v50, %v2047_v47 }
 0x100   :  { %1754 = vtanh.f32 %v240_v54 }
 0x101   :  { %262 = vrot.lane.b32.xlu0 %v261_v51, %s1893_s3 }
 0x10a   :  { %v1755_v55 = vpop.eup %1754 }
 0x10b   :  { %v242_v56 = vmul.f32 0.5, %v1755_v55 }
 0x10d   :  { %v243_v58 = vadd.f32 0.5, %v242_v56 }
 0x10f   :  { %v267_v62 = vmul.f32 %v266_v59, %v243_v58 }
 0x173   :  { %v263_v61 = vpop.permute.xlu0 %262 }
 0x174   :  { %v265_v63 = vadd.f32 %v263_v61, %v245_v60  ;;  %v516_v60 = vrot.slane %v435_v52, 1 }
 0x176   :  { %v268_v1 = vadd.f32 %v267_v62, %v265_v63 }
 0x178   :  { %1756 = vtanh.f32 %v268_v1 }
 0x182   :  { %v1757_v2 = vpop.eup %1756 }
 0x183   :  { %v270_v3 = vsub.f32 %v2018_v32, %v1757_v2 }
 0x185   :  { %v275_v5 = vrot.slane %v270_v3, %v2036_v35 }
 0x187   :  { %276 = vrot.lane.b32.xlu0 %v275_v5, %s1893_s3 }
 0x1f9   :  { %v277_v6 = vpop.permute.xlu0 %276 }
 0x1fa   :  { %v279_v7 = vmul.f32 %v277_v6, %v243_v58 }
 0x1fc   :  { %v287_v8 = vrot.slane %v279_v7, %v2047_v47 }
 0x1fe   :  { %v294_v10 = vrot.slane %v287_v8, %v2047_v47 }
 0x200   :  { %295 = vrot.lane.b32.xlu1 %v294_v10, %s1893_s3 }
 0x272   :  { %v296_v12 = vpop.permute.xlu1 %295 }
 0x273   :  { %v298_v13 = vadd.f32 %v1757_v2, %v296_v12 }
 0x275   :  { %v299_v14 = vsel %vm162_vm2, %v298_v13, %v2018_v32  ;;  %v382_v32 = vrot.slane %v301_v20, 1 }
 0x276   :  { %1544 = vmatmul.mubr.msk.f32.vlgmr.msra.gmra.mrb[2].mxu0 %vm158_vm1, %v299_v14 }
 0x277   :  { %1637 = vmatpush1.bf16.msra.mxu0 %v1977_v9  ;;  %640 = vmatprep.mubr.f32.mxu0 %v1891_v0 }
 0x278   :  { %1639 = vmatprep.subr.bf16.mxu0 %v1987_v16 }
 0x27b   :  { %1641 = vmatpush1.bf16.msra.mxu0 %v1992_v21 }
 0x27c   :  { %1643 = vmatprep.subr.bf16.mxu0 %v1994_v22 }
 0x27f   :  { %1645 = vmatpush1.bf16.msra.mxu0 %v2000_v27 }
 0x280   :  { %1647 = vmatprep.subr.bf16.mxu0 %v2003_v28 }
 0x283   :  { %1649 = vmatpush1.bf16.msra.mxu0 %v2009_v31 }
 0x284   :  { %1667 = vmatprep.subr.bf16.mxu0 %v1972_v4 }
 0x349   :  { %v371_v15 = vpop.f32.mrb[2].mxu0 }
 0x34a   :  { %v373_v17 = vpop.f32.mrb[3].mxu0  ;;  %v376_v23 = vadd.f32 %v371_v15, %v301_v20 }
 0x34b   :  { %v391_v18 = vrot.slane %v373_v17, %v2047_v47  ;;  %v403_v30 = vadd.f32 %v373_v17, %v2055_v57 }
 0x34c   :  { %v377_v24 = vmul.f32 0.5, %v376_v23 }
 0x34d   :  { %v398_v19 = vrot.slane %v391_v18, %v2047_v47 }
 0x34e   :  { %1758 = vtanh.f32 %v377_v24 }
 0x34f   :  { %399 = vrot.lane.b32.xlu1 %v398_v19, %s1893_s3  ;;  %v572_v19 = vld [vmem:[#allocation2 + $0x3] ss:$8 sm:$0x3] }
 0x358   :  { %v1759_v25 = vpop.eup %1758 }
 0x359   :  { %v379_v26 = vmul.f32 0.5, %v1759_v25 }
 0x35b   :  { %v380_v29 = vadd.f32 0.5, %v379_v26 }
 0x35d   :  { %v404_v34 = vmul.f32 %v403_v30, %v380_v29  ;;  %v653_v30 = vrot.slane %v572_v19, 1 }
 0x3c1   :  { %v400_v33 = vpop.permute.xlu1 %399 }
 0x3c2   :  { %v402_v37 = vadd.f32 %v400_v33, %v382_v32 }
 0x3c4   :  { %v405_v38 = vadd.f32 %v404_v34, %v402_v37 }
 0x3c6   :  { %1760 = vtanh.f32 %v405_v38 }
 0x3d0   :  { %v1761_v39 = vpop.eup %1760 }
 0x3d1   :  { %v407_v40 = vsub.f32 %v299_v14, %v1761_v39 }
 0x3d3   :  { %409 = vrot.lane.b32.xlu0 %v407_v40, %s1893_s3 }
 0x445   :  { %v410_v41 = vpop.permute.xlu0 %409 }
 0x446   :  { %v412_v42 = vmul.f32 %v410_v41, %v380_v29 }
 0x448   :  { %v420_v43 = vrot.slane %v412_v42, %v2047_v47 }
 0x44a   :  { %v427_v44 = vrot.slane %v420_v43, %v2047_v47 }
 0x44c   :  { %428 = vrot.lane.b32.xlu1 %v427_v44, %s1893_s3 }
 0x4be   :  { %v429_v45 = vpop.permute.xlu1 %428 }
 0x4bf   :  { %v431_v46 = vadd.f32 %v1761_v39, %v429_v45 }
 0x4c1   :  { %433 = vst.msk [vmem:[#allocation3] sm:$0x1] %vm432_vm3, %v431_v46  ;;  %1545 = vmatmul.mubr.msk.f32.vlgmr.msra.gmra.mrb[2].mxu1 %vm158_vm1, %v431_v46 }
 0x4c2   :  { %1653 = vmatpush1.bf16.msra.mxu1 %v1977_v9  ;;  %777 = vmatprep.mubr.f32.mxu1 %v1891_v0 }
 0x4c3   :  { %1655 = vmatprep.subr.bf16.mxu1 %v1987_v16 }
 0x4c6   :  { %1657 = vmatpush1.bf16.msra.mxu1 %v1992_v21 }
 0x4c7   :  { %1659 = vmatprep.subr.bf16.mxu1 %v1994_v22 }
 0x4ca   :  { %1661 = vmatpush1.bf16.msra.mxu1 %v2000_v27 }
 0x4cb   :  { %1663 = vmatprep.subr.bf16.mxu1 %v2003_v28 }
 0x4ce   :  { %1665 = vmatpush1.bf16.msra.mxu1 %v2009_v31 }
 0x4cf   :  { %1683 = vmatprep.subr.bf16.mxu1 %v1972_v4 }
 0x594   :  { %v505_v48 = vpop.f32.mrb[2].mxu1 }
 0x595   :  { %v507_v49 = vpop.f32.mrb[3].mxu1  ;;  %v510_v53 = vadd.f32 %v505_v48, %v435_v52  ;;  %v709_v52 = vld [vmem:[#allocation2 + $0x4] ss:$8 sm:$0x3] }
 0x596   :  { %v525_v50 = vrot.slane %v507_v49, %v2047_v47  ;;  %v537_v59 = vadd.f32 %v507_v49, %v2055_v57 }
 0x597   :  { %v511_v54 = vmul.f32 0.5, %v510_v53 }
 0x598   :  { %v532_v51 = vrot.slane %v525_v50, %v2047_v47 }
 0x599   :  { %1762 = vtanh.f32 %v511_v54 }
 0x59a   :  { %533 = vrot.lane.b32.xlu0 %v532_v51, %s1893_s3 }
 0x5a3   :  { %v1763_v55 = vpop.eup %1762 }
 0x5a4   :  { %v513_v56 = vmul.f32 0.5, %v1763_v55 }
 0x5a6   :  { %v514_v58 = vadd.f32 0.5, %v513_v56 }
 0x5a8   :  { %v538_v62 = vmul.f32 %v537_v59, %v514_v58 }
 0x60c   :  { %v534_v61 = vpop.permute.xlu0 %533 }
 0x60d   :  { %v536_v63 = vadd.f32 %v534_v61, %v516_v60  ;;  %v790_v60 = vrot.slane %v709_v52, 1 }
 0x60f   :  { %v539_v1 = vadd.f32 %v538_v62, %v536_v63 }
 0x611   :  { %1764 = vtanh.f32 %v539_v1 }
 0x61b   :  { %v1765_v2 = vpop.eup %1764 }
 0x61c   :  { %v541_v3 = vsub.f32 %v431_v46, %v1765_v2 }
 0x61e   :  { %v546_v5 = vrot.slane %v541_v3, %v2036_v35 }
 0x620   :  { %547 = vrot.lane.b32.xlu1 %v546_v5, %s1893_s3 }
 0x692   :  { %v548_v6 = vpop.permute.xlu1 %547 }
 0x693   :  { %v550_v7 = vmul.f32 %v548_v6, %v514_v58 }
 0x695   :  { %v558_v8 = vrot.slane %v550_v7, %v2047_v47 }
 0x697   :  { %v565_v10 = vrot.slane %v558_v8, %v2047_v47 }
 0x699   :  { %566 = vrot.lane.b32.xlu0 %v565_v10, %s1893_s3 }
 0x70b   :  { %v567_v12 = vpop.permute.xlu0 %566 }
 0x70c   :  { %v569_v13 = vadd.f32 %v1765_v2, %v567_v12 }
 0x70e   :  { %570 = vst.msk [vmem:[#allocation3 + $0x1] sm:$0x1] %vm432_vm3, %v569_v13  ;;  %1546 = vmatmul.mubr.msk.f32.vlgmr.msra.gmra.mrb[4].mxu0 %vm158_vm1, %v569_v13 }
 0x70f   :  { %1669 = vmatpush1.bf16.msra.mxu0 %v1977_v9  ;;  %914 = vmatprep.mubr.f32.mxu0 %v1891_v0 }
 0x710   :  { %1671 = vmatprep.subr.bf16.mxu0 %v1987_v16 }
 0x713   :  { %1673 = vmatpush1.bf16.msra.mxu0 %v1992_v21 }
 0x714   :  { %1675 = vmatprep.subr.bf16.mxu0 %v1994_v22 }
 0x717   :  { %1677 = vmatpush1.bf16.msra.mxu0 %v2000_v27 }
 0x718   :  { %1679 = vmatprep.subr.bf16.mxu0 %v2003_v28 }
 0x71b   :  { %1681 = vmatpush1.bf16.msra.mxu0 %v2009_v31 }
 0x71c   :  { %1699 = vmatprep.subr.bf16.mxu0 %v1972_v4 }
 0x7e1   :  { %v642_v14 = vpop.f32.mrb[4].mxu0 }
 0x7e2   :  { %v644_v15 = vpop.f32.mrb[5].mxu0  ;;  %v647_v20 = vadd.f32 %v642_v14, %v572_v19 }
 0x7e3   :  { %v662_v17 = vrot.slane %v644_v15, %v2047_v47  ;;  %v674_v29 = vadd.f32 %v644_v15, %v2055_v57 }
 0x7e4   :  { %v648_v23 = vmul.f32 0.5, %v647_v20 }
 0x7e5   :  { %v669_v18 = vrot.slane %v662_v17, %v2047_v47 }
 0x7e6   :  { %1766 = vtanh.f32 %v648_v23 }
 0x7e7   :  { %670 = vrot.lane.b32.xlu1 %v669_v18, %s1893_s3  ;;  %v846_v18 = vld [vmem:[#allocation2 + $0x5] ss:$8 sm:$0x3] }
 0x7f0   :  { %v1767_v24 = vpop.eup %1766 }
 0x7f1   :  { %v650_v25 = vmul.f32 0.5, %v1767_v24 }
 0x7f3   :  { %v651_v26 = vadd.f32 0.5, %v650_v25 }
 0x7f5   :  { %v675_v33 = vmul.f32 %v674_v29, %v651_v26  ;;  %v927_v29 = vrot.slane %v846_v18, 1 }
 0x859   :  { %v671_v32 = vpop.permute.xlu1 %670 }
 0x85a   :  { %v673_v34 = vadd.f32 %v671_v32, %v653_v30 }
 0x85c   :  { %v676_v37 = vadd.f32 %v675_v33, %v673_v34 }
 0x85e   :  { %1768 = vtanh.f32 %v676_v37 }
 0x868   :  { %v1769_v38 = vpop.eup %1768 }
 0x869   :  { %v678_v39 = vsub.f32 %v569_v13, %v1769_v38 }
 0x86b   :  { %v683_v40 = vrot.slane %v678_v39, %v2036_v35 }
 0x86d   :  { %684 = vrot.lane.b32.xlu0 %v683_v40, %s1893_s3 }
 0x8df   :  { %v685_v41 = vpop.permute.xlu0 %684 }
 0x8e0   :  { %v687_v42 = vmul.f32 %v685_v41, %v651_v26 }
 0x8e2   :  { %v695_v43 = vrot.slane %v687_v42, %v2047_v47 }
 0x8e4   :  { %v702_v44 = vrot.slane %v695_v43, %v2047_v47 }
 0x8e6   :  { %703 = vrot.lane.b32.xlu1 %v702_v44, %s1893_s3 }
 0x958   :  { %v704_v45 = vpop.permute.xlu1 %703 }
 0x959   :  { %v706_v46 = vadd.f32 %v1769_v38, %v704_v45 }
 0x95b   :  { %707 = vst.msk [vmem:[#allocation3 + $0x2] sm:$0x1] %vm432_vm3, %v706_v46  ;;  %1547 = vmatmul.mubr.msk.f32.vlgmr.msra.gmra.mrb[4].mxu1 %vm158_vm1, %v706_v46 }
 0x95c   :  { %1685 = vmatpush1.bf16.msra.mxu1 %v1977_v9  ;;  %1051 = vmatprep.mubr.f32.mxu1 %v1891_v0 }
 0x95d   :  { %1687 = vmatprep.subr.bf16.mxu1 %v1987_v16 }
 0x960   :  { %1689 = vmatpush1.bf16.msra.mxu1 %v1992_v21 }
 0x961   :  { %1691 = vmatprep.subr.bf16.mxu1 %v1994_v22 }
 0x964   :  { %1693 = vmatpush1.bf16.msra.mxu1 %v2000_v27 }
 0x965   :  { %1695 = vmatprep.subr.bf16.mxu1 %v2003_v28 }
 0x968   :  { %1697 = vmatpush1.bf16.msra.mxu1 %v2009_v31 }
 0x969   :  { %1715 = vmatprep.subr.bf16.mxu1 %v1972_v4 }
 0xa2e   :  { %v779_v48 = vpop.f32.mrb[4].mxu1 }
 0xa2f   :  { %v781_v49 = vpop.f32.mrb[5].mxu1  ;;  %v784_v53 = vadd.f32 %v779_v48, %v709_v52 }
 0xa30   :  { %v799_v50 = vrot.slane %v781_v49, %v2047_v47  ;;  %v811_v59 = vadd.f32 %v781_v49, %v2055_v57 }
 0xa31   :  { %v785_v54 = vmul.f32 0.5, %v784_v53 }
 0xa32   :  { %v806_v51 = vrot.slane %v799_v50, %v2047_v47  ;;  %v983_v50 = vld [vmem:[#allocation2 + $0x6] ss:$8 sm:$0x3] }
 0xa33   :  { %1770 = vtanh.f32 %v785_v54 }
 0xa34   :  { %807 = vrot.lane.b32.xlu0 %v806_v51, %s1893_s3 }
 0xa3d   :  { %v1771_v55 = vpop.eup %1770 }
 0xa3e   :  { %v787_v56 = vmul.f32 0.5, %v1771_v55 }
 0xa40   :  { %v788_v58 = vadd.f32 0.5, %v787_v56 }
 0xa42   :  { %v812_v4 = vmul.f32 %v811_v59, %v788_v58 }
 0xaa6   :  { %v808_v61 = vpop.permute.xlu0 %807 }
 0xaa7   :  { %v810_v62 = vadd.f32 %v808_v61, %v790_v60 }
 0xaa9   :  { %v813_v63 = vadd.f32 %v812_v4, %v810_v62 }
 0xaab   :  { %1772 = vtanh.f32 %v813_v63 }
 0xab5   :  { %v1773_v1 = vpop.eup %1772 }
 0xab6   :  { %v815_v2 = vsub.f32 %v706_v46, %v1773_v1 }
 0xab8   :  { %v820_v3 = vrot.slane %v815_v2, %v2036_v35 }
 0xaba   :  { %821 = vrot.lane.b32.xlu1 %v820_v3, %s1893_s3 }
 0xb2c   :  { %v822_v5 = vpop.permute.xlu1 %821 }
 0xb2d   :  { %v824_v6 = vmul.f32 %v822_v5, %v788_v58 }
 0xb2f   :  { %v832_v7 = vrot.slane %v824_v6, %v2047_v47 }
 0xb31   :  { %v839_v8 = vrot.slane %v832_v7, %v2047_v47  ;;  %v1120_v7 = vld [vmem:[#allocation2 + $0x7] ss:$8 sm:$0x3] }
 0xb33   :  { %840 = vrot.lane.b32.xlu0 %v839_v8, %s1893_s3 }
 0xba5   :  { %v841_v10 = vpop.permute.xlu0 %840 }
 0xba6   :  { %v843_v12 = vadd.f32 %v1773_v1, %v841_v10 }
 0xba8   :  { %844 = vst.msk [vmem:[#allocation3 + $0x3] sm:$0x1] %vm432_vm3, %v843_v12  ;;  %1548 = vmatmul.mubr.msk.f32.vlgmr.msra.gmra.mrb[6].mxu0 %vm158_vm1, %v843_v12 }
 0xba9   :  { %1701 = vmatpush1.bf16.msra.mxu0 %v1977_v9  ;;  %1188 = vmatprep.mubr.f32.mxu0 %v1891_v0 }
 0xbaa   :  { %1703 = vmatprep.subr.bf16.mxu0 %v1987_v16 }
 0xbad   :  { %1705 = vmatpush1.bf16.msra.mxu0 %v1992_v21 }
 0xbae   :  { %1707 = vmatprep.subr.bf16.mxu0 %v1994_v22 }
 0xbb1   :  { %1709 = vmatpush1.bf16.msra.mxu0 %v2000_v27 }
 0xbb2   :  { %1711 = vmatprep.subr.bf16.mxu0 %v2003_v28 }
 0xbb5   :  { %1713 = vmatpush1.bf16.msra.mxu0 %v2009_v31 }
 0xc7b   :  { %v916_v13 = vpop.f32.mrb[6].mxu0 }
 0xc7c   :  { %v918_v14 = vpop.f32.mrb[7].mxu0  ;;  %v921_v19 = vadd.f32 %v916_v13, %v846_v18 }
 0xc7d   :  { %v936_v15 = vrot.slane %v918_v14, %v2047_v47  ;;  %v948_v26 = vadd.f32 %v918_v14, %v2055_v57 }
 0xc7e   :  { %v922_v20 = vmul.f32 0.5, %v921_v19 }
 0xc7f   :  { %v943_v17 = vrot.slane %v936_v15, %v2047_v47 }
 0xc80   :  { %1774 = vtanh.f32 %v922_v20 }
 0xc81   :  { %944 = vrot.lane.b32.xlu1 %v943_v17, %s1893_s3  ;;  %v1201_v17 = vrot.slane %v1120_v7, 1 }
 0xc8a   :  { %v1775_v23 = vpop.eup %1774 }
 0xc8b   :  { %v924_v24 = vmul.f32 0.5, %v1775_v23 }
 0xc8d   :  { %v925_v25 = vadd.f32 0.5, %v924_v24 }
 0xc8f   :  { %v949_v32 = vmul.f32 %v948_v26, %v925_v25 }
 0xcf3   :  { %v945_v30 = vpop.permute.xlu1 %944 }
 0xcf4   :  { %v947_v33 = vadd.f32 %v945_v30, %v927_v29 }
 0xcf6   :  { %v950_v34 = vadd.f32 %v949_v32, %v947_v33 }
 0xcf8   :  { %1776 = vtanh.f32 %v950_v34 }
 0xd02   :  { %v1777_v37 = vpop.eup %1776 }
 0xd03   :  { %v952_v38 = vsub.f32 %v843_v12, %v1777_v37 }
 0xd05   :  { %v957_v39 = vrot.slane %v952_v38, %v2036_v35 }
 0xd07   :  { %958 = vrot.lane.b32.xlu0 %v957_v39, %s1893_s3 }
 0xd79   :  { %v959_v40 = vpop.permute.xlu0 %958 }
 0xd7a   :  { %v961_v41 = vmul.f32 %v959_v40, %v925_v25 }
 0xd7c   :  { %v969_v42 = vrot.slane %v961_v41, %v2047_v47 }
 0xd7e   :  { %v976_v43 = vrot.slane %v969_v42, %v2047_v47 }
 0xd80   :  { %977 = vrot.lane.b32.xlu1 %v976_v43, %s1893_s3 }
 0xdf2   :  { %v978_v44 = vpop.permute.xlu1 %977 }
 0xdf3   :  { %v980_v45 = vadd.f32 %v1777_v37, %v978_v44 }
 0xdf5   :  { %981 = vst.msk [vmem:[#allocation3 + $0x4] sm:$0x1] %vm432_vm3, %v980_v45  ;;  %1549 = vmatmul.mubr.msk.f32.vlgmr.msra.gmra.mrb[6].mxu1 %vm158_vm1, %v980_v45 }
 0xdf6   :  { %1717 = vmatpush1.bf16.msra.mxu1 %v1977_v9  ;;  %1323 = vmatprep.mubr.f32.mxu1 %v1891_v0 }
 0xdf7   :  { %1719 = vmatprep.subr.bf16.mxu1 %v1987_v16 }
 0xdfa   :  { %1721 = vmatpush1.bf16.msra.mxu1 %v1992_v21 }
 0xdfb   :  { %1723 = vmatprep.subr.bf16.mxu1 %v1994_v22 }
 0xdfe   :  { %1725 = vmatpush1.bf16.msra.mxu1 %v2000_v27 }
 0xdff   :  { %1727 = vmatprep.subr.bf16.mxu1 %v2003_v28  ;;  %v1064_v28 = vrot.slane %v983_v50, 1 }
 0xe02   :  { %1729 = vmatpush1.bf16.msra.mxu1 %v2009_v31 }
 0xec8   :  { %v1053_v46 = vpop.f32.mrb[6].mxu1 }
 0xec9   :  { %v1055_v48 = vpop.f32.mrb[7].mxu1  ;;  %v1058_v16 = vadd.f32 %v1053_v46, %v983_v50 }
 0xeca   :  { %v1073_v49 = vrot.slane %v1055_v48, %v2047_v47  ;;  %v1085_v27 = vadd.f32 %v1055_v48, %v2055_v57  ;;  %v1335_v48 = vrot.slane %v2041_v36, 1 }
 0xecb   :  { %v1059_v51 = vmul.f32 0.5, %v1058_v16 }
 0xecc   :  { %v1080_v9 = vrot.slane %v1073_v49, %v2047_v47 }
 0xecd   :  { %1778 = vtanh.f32 %v1059_v51 }
 0xece   :  { %1081 = vrot.lane.b32.xlu0 %v1080_v9, %s1893_s3 }
 0xed7   :  { %v1779_v21 = vpop.eup %1778 }
 0xed8   :  { %v1061_v22 = vmul.f32 0.5, %v1779_v21  ;;  %v1392_v21 = vld [vmem:[%s2289_s6] sm:$0xff] }
 0xeda   :  { %v1062_v52 = vadd.f32 0.5, %v1061_v22  ;;  %v1393_v22 = vld [vmem:[%s2289_s6 + $0x8] sm:$0xff] }
 0xedc   :  { %v1086_v31 = vmul.f32 %v1085_v27, %v1062_v52  ;;  %v1395_v27 = vld [vmem:[%s2289_s6 + $0x18] sm:$0xff] }
 0xf40   :  { %v1082_v53 = vpop.permute.xlu0 %1081 }
 0xf41   :  { %v1084_v54 = vadd.f32 %v1082_v53, %v1064_v28 }
 0xf43   :  { %v1087_v55 = vadd.f32 %v1086_v31, %v1084_v54 }
 0xf45   :  { %1780 = vtanh.f32 %v1087_v55  ;;  %v1396_v55 = vld [vmem:[%s2289_s6 + $0x20] sm:$0xff] }
 0xf4f   :  { %v1781_v56 = vpop.eup %1780 }
 0xf50   :  { %v1089_v58 = vsub.f32 %v980_v45, %v1781_v56 }
 0xf52   :  { %v1094_v59 = vrot.slane %v1089_v58, %v2036_v35 }
 0xf54   :  { %1095 = vrot.lane.b32.xlu1 %v1094_v59, %s1893_s3  ;;  %v1398_v59 = vld [vmem:[%s2289_s6 + $0x30] sm:$0xff] }
 0xfc6   :  { %v1096_v60 = vpop.permute.xlu1 %1095 }
 0xfc7   :  { %v1098_v61 = vmul.f32 %v1096_v60, %v1062_v52  ;;  %v1394_v52 = vld [vmem:[%s2289_s6 + $0x10] sm:$0xff] }
 0xfc8   :  { %v1734_v31 = vpack.c.bf16 %v1395_v27, %v1394_v52 }
 0xfc9   :  { %v1106_v4 = vrot.slane %v1098_v61, %v2047_v47 }
 0xfcb   :  { %v1113_v62 = vrot.slane %v1106_v4, %v2047_v47 }
 0xfcd   :  { %1114 = vrot.lane.b32.xlu0 %v1113_v62, %s1893_s3 }
0x103f   :  { %v1115_v63 = vpop.permute.xlu0 %1114 }
0x1040   :  { %v1117_v1 = vadd.f32 %v1781_v56, %v1115_v63  ;;  %v1397_v56 = vld [vmem:[%s2289_s6 + $0x28] sm:$0xff] }
0x1041   :  { %v1737_v58 = vpack.c.bf16 %v1397_v56, %v1396_v55 }
0x1042   :  { %1118 = vst.msk [vmem:[#allocation3 + $0x5] sm:$0x1] %vm432_vm3, %v1117_v1  ;;  %1550 = vmatmul.mubr.msk.f32.vlgmr.msra.gmra.mrb[8].mxu0 %vm158_vm1, %v1117_v1 }
0x1043   :  { %1579 = vmatprep.mubr.msk.f32.mxu0 %vm1895_vm4, %v1891_v0 }
0x1115   :  { %v1190_v2 = vpop.f32.mrb[8].mxu0 }
0x1116   :  { %v1192_v3 = vpop.f32.mrb[9].mxu0  ;;  %v1195_v8 = vadd.f32 %v1190_v2, %v1120_v7 }
0x1117   :  { %v1210_v5 = vrot.slane %v1192_v3, %v2047_v47  ;;  %v1222_v15 = vadd.f32 %v1192_v3, %v2055_v57 }
0x1118   :  { %v1196_v10 = vmul.f32 0.5, %v1195_v8 }
0x1119   :  { %v1217_v6 = vrot.slane %v1210_v5, %v2047_v47  ;;  %v1552_v5 = vld [vmem:[%s2290_s7] ss:$0 sm:$0xff]  ;;  %s1816_s7 = scalar_lea.vmem %s1517_s0, 16 }
0x111a   :  { %1782 = vtanh.f32 %v1196_v10  ;;  %p1817_p8 = scmp.ne.s32.totalorder %s1517_s0, %s1816_s7  ;;  %p1822_p10 = scmp.lt.s32.totalorder %s1820_s2, %s1816_s7 }
0x111b   :  { %1218 = vrot.lane.b32.xlu1 %v1217_v6, %s1893_s3 }
0x111c   :  { %p1823_p11 = por %p1822_p10, %p1821_p9 }
0x111e   :  { %p1824_p12 = pnand %p1823_p11, %p1817_p8 }
0x1124   :  { %v1783_v12 = vpop.eup %1782 }
0x1125   :  { %v1198_v13 = vmul.f32 0.5, %v1783_v12 }
0x1127   :  { %v1199_v14 = vadd.f32 0.5, %v1198_v13 }
0x1129   :  { %v1223_v19 = vmul.f32 %v1222_v15, %v1199_v14 }
0x118d   :  { %v1219_v18 = vpop.permute.xlu1 %1218 }
0x118e   :  { %v1221_v20 = vadd.f32 %v1219_v18, %v1201_v17 }
0x1190   :  { %v1224_v23 = vadd.f32 %v1223_v19, %v1221_v20 }
0x1192   :  { %1784 = vtanh.f32 %v1224_v23 }
0x119c   :  { %v1785_v24 = vpop.eup %1784 }
0x119d   :  { %v1226_v25 = vsub.f32 %v1117_v1, %v1785_v24 }
0x119f   :  { %v1231_v26 = vrot.slane %v1226_v25, %v2036_v35 }
0x11a1   :  { %1232 = vrot.lane.b32.xlu0 %v1231_v26, %s1893_s3 }
0x1213   :  { %v1233_v29 = vpop.permute.xlu0 %1232 }
0x1214   :  { %v1235_v30 = vmul.f32 %v1233_v29, %v1199_v14 }
0x1216   :  { %v1243_v32 = vrot.slane %v1235_v30, %v2047_v47 }
0x1218   :  { %v1250_v33 = vrot.slane %v1243_v32, %v2047_v47 }
0x121a   :  { %1251 = vrot.lane.b32.xlu1 %v1250_v33, %s1893_s3 }
0x128c   :  { %v1252_v34 = vpop.permute.xlu1 %1251 }
0x128d   :  { %v1254_v37 = vadd.f32 %v1785_v24, %v1252_v34 }
0x128f   :  { %1255 = vst.msk [vmem:[#allocation3 + $0x6] sm:$0x1] %vm432_vm3, %v1254_v37  ;;  %1551 = vmatmul.mubr.msk.f32.vlgmr.msra.gmra.mrb[8].mxu1 %vm158_vm1, %v1254_v37 }
0x1362   :  { %v1325_v38 = vpop.f32.mrb[8].mxu1 }
0x1363   :  { %v1327_v39 = vpop.f32.mrb[9].mxu1  ;;  %v1330_v42 = vadd.f32 %v1325_v38, %v2041_v36  ;;  %v1894_v36 = vmov 0.0|0.0  }
0x1364   :  { %v1344_v40 = vrot.slane %v1327_v39, %v2047_v47  ;;  %v1356_v49 = vadd.f32 %v1327_v39, %v2055_v57  ;;  %1730 = vmatprep.subr.bf16.mxu0 %v1894_v36  ;;  %v1731_v57 = vpack.c.bf16 %v1393_v22, %v1392_v21 }
0x1365   :  { %v1331_v43 = vmul.f32 0.5, %v1330_v42 }
0x1366   :  { %v1351_v41 = vrot.slane %v1344_v40, %v2047_v47  ;;  %1732 = vmatpush3.bf16.msra.mxu0 %v1731_v57 }
0x1367   :  { %1786 = vtanh.f32 %v1331_v43  ;;  %1733 = vmatprep.subr.bf16.mxu0 %v1894_v36 }
0x1368   :  { %1352 = vrot.lane.b32.xlu0 %v1351_v41, %s1893_s3 }
0x136a   :  { %1735 = vmatpush3.bf16.msra.mxu0 %v1734_v31 }
0x136b   :  { %1736 = vmatprep.subr.bf16.mxu0 %v1894_v36 }
0x136e   :  { %1738 = vmatpush3.bf16.msra.mxu0 %v1737_v58 }
0x136f   :  { %1739 = vmatprep.subr.bf16.mxu0 %v1894_v36 }
0x1371   :  { %v1787_v44 = vpop.eup %1786 }
0x1372   :  { %v1333_v45 = vmul.f32 0.5, %v1787_v44 }
0x1374   :  { %v1334_v46 = vadd.f32 0.5, %v1333_v45 }
0x1376   :  { %v1357_v50 = vmul.f32 %v1356_v49, %v1334_v46 }
0x13da   :  { %v1353_v9 = vpop.permute.xlu0 %1352 }
0x13db   :  { %v1355_v16 = vadd.f32 %v1353_v9, %v1335_v48 }
0x13dd   :  { %v1358_v51 = vadd.f32 %v1357_v50, %v1355_v16 }
0x13df   :  { %1788 = vtanh.f32 %v1358_v51 }
0x13e9   :  { %v1789_v28 = vpop.eup %1788 }
0x13ea   :  { %v1360_v53 = vsub.f32 %v1254_v37, %v1789_v28 }
0x13ec   :  { %v1365_v54 = vrot.slane %v1360_v53, %v2036_v35  ;;  %v1399_v35 = vld [vmem:[%s2289_s6 + $0x38] sm:$0xff] }
0x13ed   :  { %v1740_v60 = vpack.c.bf16 %v1399_v35, %v1398_v59 }
0x13ee   :  { %1366 = vrot.lane.b32.xlu1 %v1365_v54, %s1893_s3 }
0x13ef   :  { %1741 = vmatpush3.bf16.msra.mxu0 %v1740_v60 }
0x1460   :  { %v1367_v61 = vpop.permute.xlu1 %1366 }
0x1461   :  { %v1369_v4 = vmul.f32 %v1367_v61, %v1334_v46 }
0x1463   :  { %v1377_v62 = vrot.slane %v1369_v4, %v2047_v47 }
0x1465   :  { %v1384_v63 = vrot.slane %v1377_v62, %v2047_v47 }
0x1467   :  { %1385 = vrot.lane.b32.xlu0 %v1384_v63, %s1893_s3 }
0x14d9   :  { %v1386_v1 = vpop.permute.xlu0 %1385 }
0x14da   :  { %v1388_v2 = vadd.f32 %v1789_v28, %v1386_v1 }
0x14dc   :  { %1389 = vst.msk [vmem:[#allocation3 + $0x7] sm:$0x1] %vm432_vm3, %v1388_v2  ;;  %v1390_v3 = vsel %vm162_vm2, %v1254_v37, %v1388_v2 }
0x14dd   :  { %1494 = vst.msk [vmem:[#allocation8] sm:$0x1] %vm1493_vm5, %v1390_v3 }
0x14e3   :  { %v1391_v0 = vld [vmem:[#allocation3] sm:$0xff] }
0x14e4   :  { %1580 = vmatmul.mubr.msk.f32.vlgmr.msra.gmra.mrb[10].mxu0 %vm158_vm1, %v1391_v0 }
0x15b7   :  { %v1476_v47 = vpop.f32.mrb[10].mxu0 }
0x15b8   :  { %v1477_v6 = vadd.f32 %v1552_v5, %v1476_v47  ;;  %v1581_v7 = vpop.f32.mrb[11].mxu0 }
0x15ba   :  { %v1480_v8 = vsel %vm82_vm0, %v1477_v6, -inf }
0x15bb   :  { %1481 = vmax.xlane.f32.xlu1 %v1480_v8 }
0x1648   :  { %v1482_v10 = vpop.xlane.xlu1 %1481 }
0x1649   :  { %v1483_v12 = vsub.f32 %v1477_v6, %v1482_v10 }
0x164b   :  { %v1484_v13 = vmul.f32 1.442695, %v1483_v12 }
0x164d   :  { %1790 = vpow2.f32 %v1484_v13 }
0x1657   :  { %v1791_v11 = vpop.eup %1790 }
0x1658   :  { %v1486_v14 = vsel %vm82_vm0, %v1791_v11, 0.0 }
0x1659   :  { %1487 = vadd.xlane.f32.xlu0 %v1486_v14 }
0x166f   :  { %1496 = vrot.lane.b32.xlu0 %v1390_v3, %s1896_s14 }
0x1670   :  { %1827 = shalt.err (!%p1824_p12)
}
0x1671   :  { %s1828_s3 = scalar_lea.hbm %s2292_s9, 16 }
0x1672   :  { %p1829_p13 = scmp.ne.s32.totalorder %s2292_s9, %s1828_s3  ;;  %p1832_p0 = scmp.lt.u32.totalorder %s1828_s3, %s2292_s9 }
0x1674   :  { %p1834_p1 = pnand %p1832_p0, %p1829_p13 }
0x1676   :  { %1837 = shalt.err (!%p1834_p1)
}
0x1677   :  { %1519 = dma.vmem_to_hbm [thread:$0]  %s1517_s0, 16, %s2292_s9, [#allocation9]  }
0x1678   :  { %s1898_s22 = smov [#allocation10]  }
0x1679   :  { %s1526_s23 = sshll.u32 %s1898_s22, 4  ;;  %s1527_s23 = int_to_ptr.vmem [resolvable:$true] %s1526_s23 }
0x167a   :  { %s1838_s24 = scalar_lea.vmem %s1527_s23, 16  ;;  %s1842_s25 = scalar_lea.vmem %s1527_s23, 32 }
0x167b   :  { %p1839_p2 = scmp.ne.s32.totalorder %s1527_s23, %s1838_s24  ;;  %p1843_p3 = scmp.lt.s32.totalorder %s1527_s23, %s1527_s23 }
0x167c   :  { %p1844_p4 = scmp.lt.s32.totalorder %s1842_s25, %s1838_s24 }
0x167e   :  { %p1845_p5 = por %p1844_p4, %p1843_p3 }
0x1680   :  { %p1846_p6 = pnand %p1845_p5, %p1839_p2 }
0x16e6   :  { %v1488_v15 = vpop.xlane.xlu0 %1487 }
0x16e7   :  { %1792 = vlog2.f32 %v1488_v15 }
0x16ea   :  { %v1497_v17 = vpop.permute.xlu0 %1496 }
0x16eb   :  { %1499 = vst.msk [vmem:[#allocation10] sm:$0x1] %vm1493_vm5, %v1497_v17 }
0x16ec   :  { %1849 = shalt.err (!%p1846_p6)
}
0x16ed   :  { %s1850_s9 = scalar_lea.hbm %s2293_s10, 16 }
0x16ee   :  { %p1851_p7 = scmp.ne.s32.totalorder %s2293_s10, %s1850_s9  ;;  %p1854_p8 = scmp.lt.u32.totalorder %s1850_s9, %s2293_s10 }
0x16f0   :  { %p1856_p9 = pnand %p1854_p8, %p1851_p7 }
0x16f2   :  { %1859 = shalt.err (!%p1856_p9)
}
0x16f3   :  { %1529 = dma.vmem_to_hbm [thread:$0]  %s1527_s23, 16, %s2293_s10, [#allocation9]   ;;  %v1793_v18 = vpop.eup %1792 }
0x16f4   :  { %s1899_s6 = smov [#allocation7]   ;;  %v1490_v19 = vmul.f32 0.6931472, %v1793_v18 }
0x16f5   :  { %s1506_s13 = sshll.u32 %s1899_s6, 4  ;;  %s1507_s13 = int_to_ptr.vmem [resolvable:$true] %s1506_s13 }
0x16f6   :  { %v1491_v20 = vsub.f32 %v1483_v12, %v1490_v19  ;;  %s1860_s14 = scalar_lea.vmem %s1507_s13, 128  ;;  %p1865_p11 = scmp.lt.s32.totalorder %s1507_s13, %s1507_s13 }
0x16f7   :  { %p1861_p10 = scmp.ne.s32.totalorder %s1507_s13, %s1860_s14  ;;  %p1866_p12 = scmp.lt.s32.totalorder %s1860_s14, %s1860_s14 }
0x16f8   :  { %1492 = vst.msk [vmem:[#allocation7] sm:$0xff] %vm82_vm0, %v1491_v20 }
0x16f9   :  { %p1867_p13 = por %p1866_p12, %p1865_p11 }
0x16fb   :  { %p1868_p0 = pnand %p1867_p13, %p1861_p10 }
0x16fd   :  { %1871 = shalt.err (!%p1868_p0)
}
0x16fe   :  { %s1872_s7 = scalar_lea.hbm %s2291_s8, 128 }
0x16ff   :  { %p1873_p1 = scmp.ne.s32.totalorder %s2291_s8, %s1872_s7  ;;  %p1876_p2 = scmp.lt.u32.totalorder %s1872_s7, %s2291_s8 }
0x1701   :  { %p1878_p3 = pnand %p1876_p2, %p1873_p1 }
0x1703   :  { %1881 = shalt.err (!%p1878_p3)
}
0x1704   :  { %1509 = dma.vmem_to_hbm [thread:$0]  %s1507_s13, 128, %s2291_s8, [#allocation6]  }
0x1705   :  { %1884 = dma.done.wait [#allocation6], 128  }
0x1706   :  { %1885 = vsyncadd [#allocation6], 4294967168 }
0x1707   :  { %1886 = dma.done.wait [#allocation9], 32  }
0x1708   :  { %1887 = vsyncadd [#allocation9], 4294967264 }
0x1709   :  { %1539 = vsyncpa [#allocation5], 1 }
0x170a   :  { %1540 = vsyncpa [#allocation6], 1 }
0x170b   :  { %1541 = vsyncpa [#allocation9], 1 }

</bundles_post_ra>
